<compile_context>
chip_gen: v7x
topology: tpu7x:2x2x1
jax: 0.10.0
libtpu: 0.0.40
codegen_flags: <defaults>
</compile_context>

<pallas_src>
import functools
import math

import jax
import jax.numpy as jnp
from jax.experimental import pallas as pl
from jax.experimental.pallas import tpu as pltpu

LN_EPS = 1e-12            # BERT / MiniLM layer_norm_eps
_TM_CAP = 512             # token-row tile for linear / layernorm kernels
_VMEM_LIMIT = 48 * 1024 * 1024   # explicit budget: fits v7x 64 MiB physical


def _pick_tm(m):
    # full block when small (block == full dim is always legal), else a
    # 512-row tile (multiple of 8 sublanes) with partial edge blocks masked.
    return m if m <= _TM_CAP else _TM_CAP


def _pick_group_heads(heads, head_dim):
    # smallest divisor of `heads` whose lane width reaches 128 (lane-dense
    # attention output blocks, (B, G) parallel grid for v7x dual-TC); all
    # heads in one group when the whole hidden dim is narrower than 128.
    for g in range(1, heads + 1):
        if heads % g == 0 and g * head_dim >= 128:
            return g
    return heads


def _compiler_params(*semantics):
    return pltpu.CompilerParams(dimension_semantics=semantics,
                                vmem_limit_bytes=_VMEM_LIMIT)


# --------------------------- Pallas kernels ---------------------------------

def _linear_kernel(x_ref, w_ref, b_ref, o_ref, *, activation):
    x = x_ref[...].astype(jnp.bfloat16)
    y = jnp.dot(x, w_ref[...], preferred_element_type=jnp.float32) + b_ref[...]
    if activation == "gelu":
        # TODO(synk): HF BERT uses exact (erf) GELU; tanh approximation used
        # here to stay on well-supported EUP lowerings.
        y = jax.nn.gelu(y, approximate=True)
    o_ref[...] = y.astype(o_ref.dtype)


def linear(x, w, b, activation=None):
    M, K = x.shape
    N = w.shape[1]
    TM = _pick_tm(M)
    return pl.pallas_call(
        functools.partial(_linear_kernel, activation=activation),
        out_shape=jax.ShapeDtypeStruct((M, N), jnp.bfloat16),
        grid=(pl.cdiv(M, TM),),
        in_specs=[
            pl.BlockSpec((TM, K), lambda i: (i, 0)),
            pl.BlockSpec((K, N), lambda i: (0, 0)),
            pl.BlockSpec((1, N), lambda i: (0, 0)),
        ],
        out_specs=pl.BlockSpec((TM, N), lambda i: (i, 0)),
        compiler_params=_compiler_params("parallel"),
    )(x, w, b.reshape(1, N))


def _linear_residual_ln_kernel(x_ref, w_ref, b_ref, r_ref, g_ref, be_ref,
                               o_ref, *, eps):
    x = x_ref[...].astype(jnp.bfloat16)
    y = jnp.dot(x, w_ref[...], preferred_element_type=jnp.float32)
    y = y + b_ref[...] + r_ref[...].astype(jnp.float32)   # bias + residual
    # single-pass mean / variance (E[y^2] - mu^2), gamma folded into scale
    mu = jnp.mean(y, axis=-1, keepdims=True)
    var = jnp.maximum(jnp.mean(y * y, axis=-1, keepdims=True) - mu * mu, 0.0)
    scale = jax.lax.rsqrt(var + eps) * g_ref[...]
    o_ref[...] = ((y - mu) * scale + be_ref[...]).astype(o_ref.dtype)


def linear_residual_ln(x, w, b, residual, gamma, beta, eps=LN_EPS):
    """out = LayerNorm(x @ w + b + residual) — fused projection epilogue."""
    M, K = x.shape
    N = w.shape[1]
    TM = _pick_tm(M)
    return pl.pallas_call(
        functools.partial(_linear_residual_ln_kernel, eps=eps),
        out_shape=jax.ShapeDtypeStruct((M, N), jnp.bfloat16),
        grid=(pl.cdiv(M, TM),),
        in_specs=[
            pl.BlockSpec((TM, K), lambda i: (i, 0)),
            pl.BlockSpec((K, N), lambda i: (0, 0)),
            pl.BlockSpec((1, N), lambda i: (0, 0)),
            pl.BlockSpec((TM, N), lambda i: (i, 0)),
            pl.BlockSpec((1, N), lambda i: (0, 0)),
            pl.BlockSpec((1, N), lambda i: (0, 0)),
        ],
        out_specs=pl.BlockSpec((TM, N), lambda i: (i, 0)),
        compiler_params=_compiler_params("parallel"),
    )(x, w, b.reshape(1, N), residual, gamma.reshape(1, N), beta.reshape(1, N))


def _layernorm_kernel(x_ref, g_ref, b_ref, o_ref, *, eps):
    y = x_ref[...].astype(jnp.float32)
    mu = jnp.mean(y, axis=-1, keepdims=True)
    var = jnp.maximum(jnp.mean(y * y, axis=-1, keepdims=True) - mu * mu, 0.0)
    scale = jax.lax.rsqrt(var + eps) * g_ref[...]
    o_ref[...] = ((y - mu) * scale + b_ref[...]).astype(o_ref.dtype)


def layernorm(x, gamma, beta, eps=LN_EPS):
    M, H = x.shape
    TM = _pick_tm(M)
    return pl.pallas_call(
        functools.partial(_layernorm_kernel, eps=eps),
        out_shape=jax.ShapeDtypeStruct((M, H), jnp.bfloat16),
        grid=(pl.cdiv(M, TM),),
        in_specs=[
            pl.BlockSpec((TM, H), lambda i: (i, 0)),
            pl.BlockSpec((1, H), lambda i: (0, 0)),
            pl.BlockSpec((1, H), lambda i: (0, 0)),
        ],
        out_specs=pl.BlockSpec((TM, H), lambda i: (i, 0)),
        compiler_params=_compiler_params("parallel"),
    )(x, gamma.reshape(1, H), beta.reshape(1, H))


def _qkv_attention_kernel(x_ref, w_ref, b_ref, bias_ref, o_ref, *,
                          group_heads, head_dim, scale):
    # Fused QKV projection + multi-head attention for one (batch, head-group)
    # grid step.  QKV slab never touches HBM.
    x = x_ref[0].astype(jnp.bfloat16)          # (S, H)
    w = w_ref[0]                               # (H, 3*gw) bf16
    bias = bias_ref[0]                         # (1, S)  additive key mask
    gw = group_heads * head_dim
    qkv = jnp.dot(x, w, preferred_element_type=jnp.float32) + b_ref[0]  # (S,3gw)
    for h in range(group_heads):               # static unroll over group heads
        off = h * head_dim
        # softmax scale folded into q: touches S*d elements, not S*S scores
        q = (qkv[:, off:off + head_dim] * scale).astype(jnp.bfloat16)
        k = qkv[:, gw + off:gw + off + head_dim].astype(jnp.bfloat16)
        v = qkv[:, 2 * gw + off:2 * gw + off + head_dim].astype(jnp.bfloat16)
        # contract the head dim of both operands -> no explicit k.T transpose
        s = jax.lax.dot_general(q, k, (((1,), (1,)), ((), ())),
                                preferred_element_type=jnp.float32) + bias
        m = jnp.max(s, axis=-1, keepdims=True)
        p = jnp.exp(s - m)
        p = p * pl.reciprocal(jnp.sum(p, axis=-1, keepdims=True), approx=True)
        ctx = jnp.dot(p.astype(jnp.bfloat16), v,
                      preferred_element_type=jnp.float32)
        # write each head's context straight into the output block (no concat)
        o_ref[0, :, off:off + head_dim] = ctx.astype(o_ref.dtype)


def qkv_attention(x3, w_grouped, b_grouped, bias3, *, heads):
    # x3: (B, S, H) bf16; w_grouped: (G, H, 3*gw) bf16; bias3: (B, 1, S) f32
    B, S, H = x3.shape
    G = w_grouped.shape[0]
    head_dim = H // heads
    group_heads = heads // G
    gw = group_heads * head_dim
    scale = 1.0 / math.sqrt(head_dim)
    return pl.pallas_call(
        functools.partial(_qkv_attention_kernel, group_heads=group_heads,
                          head_dim=head_dim, scale=scale),
        out_shape=jax.ShapeDtypeStruct((B, S, H), jnp.bfloat16),
        grid=(B, G),
        in_specs=[
            pl.BlockSpec((1, S, H), lambda b, g: (b, 0, 0)),
            pl.BlockSpec((1, H, 3 * gw), lambda b, g: (g, 0, 0)),
            pl.BlockSpec((1, 1, 3 * gw), lambda b, g: (g, 0, 0)),
            pl.BlockSpec((1, 1, S), lambda b, g: (b, 0, 0)),
        ],
        out_specs=pl.BlockSpec((1, S, gw), lambda b, g: (b, 0, g)),
        compiler_params=_compiler_params("parallel", "parallel"),
    )(x3, w_grouped, b_grouped, bias3)


def _pool_normalize_kernel(x_ref, m_ref, o_ref):
    x = x_ref[...].astype(jnp.float32)                   # (TB, S, H)
    m = m_ref[...]                                       # (TB, S)   f32
    summed = jnp.sum(x * m[:, :, None], axis=1)          # (TB, H) masked sum
    denom = jnp.maximum(jnp.sum(m, axis=1, keepdims=True), 1e-9)   # clamp
    emb = summed * pl.reciprocal(denom, approx=True)
    nrm = jnp.maximum(jnp.sqrt(jnp.sum(emb * emb, axis=1, keepdims=True)),
                      1e-12)                             # F.normalize eps
    o_ref[...] = emb / nrm                               # exact: unit-norm out


def pool_normalize(token_embeddings, mask):
    # tiled over batch ("parallel") — bounded VMEM at production B/S and
    # lets v7x's two TensorCores split the pooler.
    B, S, H = token_embeddings.shape
    TB = B if B <= 8 else 8
    return pl.pallas_call(
        _pool_normalize_kernel,
        out_shape=jax.ShapeDtypeStruct((B, H), jnp.float32),
        grid=(pl.cdiv(B, TB),),
        in_specs=[
            pl.BlockSpec((TB, S, H), lambda i: (i, 0, 0)),
            pl.BlockSpec((TB, S), lambda i: (i, 0)),
        ],
        out_specs=pl.BlockSpec((TB, H), lambda i: (i, 0)),
        compiler_params=_compiler_params("parallel"),
    )(token_embeddings, mask.astype(jnp.float32))


# ----------------------------- model glue -----------------------------------

def init_params(key, *, vocab, hidden, layers, heads, intermediate, max_pos,
                type_vocab=2):
    def nrm(k, shape):
        return 0.02 * jax.random.normal(k, shape, dtype=jnp.float32)

    head_dim = hidden // heads
    group_heads = _pick_group_heads(heads, head_dim)
    G = heads // group_heads
    gw = group_heads * head_dim

    keys = jax.random.split(key, 4 + layers)
    params = {
        "word_emb": nrm(keys[0], (vocab, hidden)),
        "pos_emb": nrm(keys[1], (max_pos, hidden)),
        "type_emb": nrm(keys[2], (type_vocab, hidden)),
        "emb_ln_g": jnp.ones((hidden,), jnp.float32),
        "emb_ln_b": jnp.zeros((hidden,), jnp.float32),
        "layers": [],
    }

    def group_cols(w):
        # (H, heads*d) head-major columns -> (G, H, gw) per head-group slabs
        return w.reshape(hidden, G, gw).transpose(1, 0, 2)

    for l in range(layers):
        lk = jax.random.split(keys[4 + l], 6)
        wq = nrm(lk[0], (hidden, hidden))
        wk = nrm(lk[1], (hidden, hidden))
        wv = nrm(lk[2], (hidden, hidden))
        wqkv_g = jnp.concatenate(
            [group_cols(wq), group_cols(wk), group_cols(wv)], axis=2)
        params["layers"].append({
            # per-head-group fused QKV weights, bf16 for the MXU path
            "wqkv_g": wqkv_g.astype(jnp.bfloat16),          # (G, H, 3*gw)
            "bqkv_g": jnp.zeros((G, 1, 3 * gw), jnp.float32),
            "wo": nrm(lk[3], (hidden, hidden)).astype(jnp.bfloat16),
            "bo": jnp.zeros((hidden,), jnp.float32),
            "ln1_g": jnp.ones((hidden,), jnp.float32),
            "ln1_b": jnp.zeros((hidden,), jnp.float32),
            "w1": nrm(lk[4], (hidden, intermediate)).astype(jnp.bfloat16),
            "b1": jnp.zeros((intermediate,), jnp.float32),
            "w2": nrm(lk[5], (intermediate, hidden)).astype(jnp.bfloat16),
            "b2": jnp.zeros((hidden,), jnp.float32),
            "ln2_g": jnp.ones((hidden,), jnp.float32),
            "ln2_b": jnp.zeros((hidden,), jnp.float32),
        })
    return params


def gist_minilm_forward(params, input_ids, attention_mask, *, heads):
    B, S = input_ids.shape
    H = params["word_emb"].shape[1]

    # --- BERT embeddings (gather is plain-JAX glue) ---
    tok = jnp.take(params["word_emb"], input_ids, axis=0)        # (B, S, H)
    pos = params["pos_emb"][:S][None, :, :]
    typ = params["type_emb"][0][None, None, :]                   # type ids = 0
    x = (tok + pos + typ).reshape(B * S, H)
    x = layernorm(x, params["emb_ln_g"], params["emb_ln_b"])     # bf16 stream

    amask = attention_mask.astype(jnp.float32)                   # (B, S)
    bias3 = ((1.0 - amask) * -1e9).reshape(B, 1, S)              # key mask

    # --- transformer encoder layers ---
    for lp in params["layers"]:
        ctx = qkv_attention(x.reshape(B, S, H), lp["wqkv_g"], lp["bqkv_g"],
                            bias3, heads=heads)                  # (B, S, H)
        x = linear_residual_ln(ctx.reshape(B * S, H), lp["wo"], lp["bo"],
                               x, lp["ln1_g"], lp["ln1_b"])      # attn + LN1
        ff = linear(x, lp["w1"], lp["b1"], activation="gelu")    # (B*S, I)
        x = linear_residual_ln(ff, lp["w2"], lp["b2"],
                               x, lp["ln2_g"], lp["ln2_b"])      # ffn + LN2

    # --- masked mean pooling + L2 normalize (the Model.forward body) ---
    return pool_normalize(x.reshape(B, S, H), amask)             # (B, H) f32


# ------------------------------- main ----------------------------------------

if __name__ == "__main__":
    # Small synthetic MiniLM-style config.
    VOCAB, HIDDEN, LAYERS, HEADS, INTER, MAX_POS = 50, 32, 2, 4, 64, 16
    B, S = 2, 8

    key = jax.random.PRNGKey(0)
    pkey, ikey = jax.random.split(key)
    params = init_params(pkey, vocab=VOCAB, hidden=HIDDEN, layers=LAYERS,
                         heads=HEADS, intermediate=INTER, max_pos=MAX_POS)

    input_ids = jax.random.randint(ikey, (B, S), 0, VOCAB, dtype=jnp.int32)
    attention_mask = jnp.array([[1, 1, 1, 1, 1, 1, 1, 1],
                                [1, 1, 1, 1, 1, 0, 0, 0]], dtype=jnp.int32)

    fwd = jax.jit(functools.partial(gist_minilm_forward, heads=HEADS))
    out = fwd(params, input_ids, attention_mask)
    jax.block_until_ready(out)
    assert out.shape == (B, HIDDEN) and out.dtype == jnp.float32
    assert bool(jnp.all(jnp.isfinite(out)))
    print("KERNEL_OK")
</pallas_src>

<mosaic_0001>
module attributes {stable_mosaic.version = 11 : i64} {
  func.func @_linear_residual_ln_kernel(%arg0: i32, %arg1: memref<16x32xbf16, #tpu.memory_space<vmem>>, %arg2: memref<32x32xbf16, #tpu.memory_space<vmem>>, %arg3: memref<1x32xf32, #tpu.memory_space<vmem>>, %arg4: memref<16x32xbf16, #tpu.memory_space<vmem>>, %arg5: memref<1x32xf32, #tpu.memory_space<vmem>>, %arg6: memref<1x32xf32, #tpu.memory_space<vmem>>, %arg7: memref<16x32xbf16, #tpu.memory_space<vmem>>) attributes {dimension_semantics = [#tpu.dimension_semantics<parallel>], iteration_bounds = array<i64: 1>, scalar_prefetch = 0 : i64, scratch_operands = 0 : i64, tpu.core_type = #tpu.core_type<tc>, window_params = [{transform_indices = @transform_0, window_bounds = array<i64: 16, 32>}, {pipeline_mode = #tpu.pipeline_mode<synchronous>, transform_indices = @transform_1, window_bounds = array<i64: 32, 32>}, {pipeline_mode = #tpu.pipeline_mode<synchronous>, transform_indices = @transform_2, window_bounds = array<i64: 1, 32>}, {transform_indices = @transform_3, window_bounds = array<i64: 16, 32>}, {pipeline_mode = #tpu.pipeline_mode<synchronous>, transform_indices = @transform_4, window_bounds = array<i64: 1, 32>}, {pipeline_mode = #tpu.pipeline_mode<synchronous>, transform_indices = @transform_5, window_bounds = array<i64: 1, 32>}, {transform_indices = @transform_6, window_bounds = array<i64: 16, 32>}]} {
    %c0 = arith.constant 0 : index
    %c0_0 = arith.constant 0 : index
    %0 = vector.load %arg1[%c0, %c0_0] : memref<16x32xbf16, #tpu.memory_space<vmem>>, vector<16x32xbf16>
    %c0_1 = arith.constant 0 : index
    %c0_2 = arith.constant 0 : index
    %1 = vector.load %arg2[%c0_1, %c0_2] : memref<32x32xbf16, #tpu.memory_space<vmem>>, vector<32x32xbf16>
    %cst = arith.constant dense<0.000000e+00> : vector<16x32xf32>
    %2 = tpu.matmul %0, %1, %cst {dimension_numbers = #tpu.dot_dimension_numbers<[1], [0], [0], [1], [0, 0, 1, 1], [], []>} : vector<16x32xbf16>, vector<32x32xbf16>, vector<16x32xf32> -> vector<16x32xf32>
    %c0_3 = arith.constant 0 : index
    %c0_4 = arith.constant 0 : index
    %3 = vector.load %arg3[%c0_3, %c0_4] : memref<1x32xf32, #tpu.memory_space<vmem>>, vector<1x32xf32>
    %4 = vector.broadcast %3 : vector<1x32xf32> to vector<16x32xf32>
    %5 = arith.addf %2, %4 : vector<16x32xf32>
    %c0_5 = arith.constant 0 : index
    %c0_6 = arith.constant 0 : index
    %6 = vector.load %arg4[%c0_5, %c0_6] : memref<16x32xbf16, #tpu.memory_space<vmem>>, vector<16x32xbf16>
    %7 = arith.extf %6 : vector<16x32xbf16> to vector<16x32xf32>
    %8 = arith.addf %5, %7 : vector<16x32xf32>
    %cst_7 = arith.constant dense<0.000000e+00> : vector<16xf32>
    %9 = vector.multi_reduction <add>, %8, %cst_7 [1] : vector<16x32xf32> to vector<16xf32>
    %10 = vector.shape_cast %9 : vector<16xf32> to vector<16x1xf32>
    %cst_8 = arith.constant 3.200000e+01 : f32
    %11 = vector.broadcast %cst_8 : f32 to vector<16x1xf32>
    %12 = arith.divf %10, %11 : vector<16x1xf32>
    %13 = arith.mulf %8, %8 : vector<16x32xf32>
    %cst_9 = arith.constant dense<0.000000e+00> : vector<16xf32>
    %14 = vector.multi_reduction <add>, %13, %cst_9 [1] : vector<16x32xf32> to vector<16xf32>
    %15 = vector.shape_cast %14 : vector<16xf32> to vector<16x1xf32>
    %cst_10 = arith.constant 3.200000e+01 : f32
    %16 = vector.broadcast %cst_10 : f32 to vector<16x1xf32>
    %17 = arith.divf %15, %16 : vector<16x1xf32>
    %18 = arith.mulf %12, %12 : vector<16x1xf32>
    %19 = arith.subf %17, %18 : vector<16x1xf32>
    %cst_11 = arith.constant 0.000000e+00 : f32
    %20 = vector.broadcast %cst_11 : f32 to vector<16x1xf32>
    %21 = arith.maximumf %19, %20 : vector<16x1xf32>
    %cst_12 = arith.constant 9.99999996E-13 : f32
    %22 = vector.broadcast %cst_12 : f32 to vector<16x1xf32>
    %23 = arith.addf %21, %22 : vector<16x1xf32>
    %24 = math.rsqrt %23 : vector<16x1xf32>
    %c0_13 = arith.constant 0 : index
    %c0_14 = arith.constant 0 : index
    %25 = vector.load %arg5[%c0_13, %c0_14] : memref<1x32xf32, #tpu.memory_space<vmem>>, vector<1x32xf32>
    %26 = vector.broadcast %24 : vector<16x1xf32> to vector<16x32xf32>
    %27 = vector.broadcast %25 : vector<1x32xf32> to vector<16x32xf32>
    %28 = arith.mulf %26, %27 : vector<16x32xf32>
    %29 = vector.broadcast %12 : vector<16x1xf32> to vector<16x32xf32>
    %30 = arith.subf %8, %29 : vector<16x32xf32>
    %31 = arith.mulf %30, %28 : vector<16x32xf32>
    %c0_15 = arith.constant 0 : index
    %c0_16 = arith.constant 0 : index
    %32 = vector.load %arg6[%c0_15, %c0_16] : memref<1x32xf32, #tpu.memory_space<vmem>>, vector<1x32xf32>
    %33 = vector.broadcast %32 : vector<1x32xf32> to vector<16x32xf32>
    %34 = arith.addf %31, %33 : vector<16x32xf32>
    %35 = arith.truncf %34 : vector<16x32xf32> to vector<16x32xbf16>
    %c0_17 = arith.constant 0 : index
    %c0_18 = arith.constant 0 : index
    %36 = vector.load %arg7[%c0_17, %c0_18] : memref<16x32xbf16, #tpu.memory_space<vmem>>, vector<16x32xbf16>
    tpu.vector_store %arg7[%c0_17, %c0_18], %35 {strides = array<i32>} : memref<16x32xbf16, #tpu.memory_space<vmem>>, vector<16x32xbf16>,
    return
  }
  func.func @transform_0(%arg0: i32) -> (i32, i32) {
    %c0_i32 = arith.constant 0 : i32
    %c0_i32_0 = arith.constant 0 : i32
    return %arg0, %c0_i32 : i32, i32
  }
  func.func @transform_1(%arg0: i32) -> (i32, i32) {
    %c0_i32 = arith.constant 0 : i32
    %c0_i32_0 = arith.constant 0 : i32
    %c0_i32_1 = arith.constant 0 : i32
    return %c0_i32, %c0_i32_0 : i32, i32
  }
  func.func @transform_2(%arg0: i32) -> (i32, i32) {
    %c0_i32 = arith.constant 0 : i32
    %c0_i32_0 = arith.constant 0 : i32
    %c0_i32_1 = arith.constant 0 : i32
    return %c0_i32, %c0_i32_0 : i32, i32
  }
  func.func @transform_3(%arg0: i32) -> (i32, i32) {
    %c0_i32 = arith.constant 0 : i32
    %c0_i32_0 = arith.constant 0 : i32
    return %arg0, %c0_i32 : i32, i32
  }
  func.func @transform_4(%arg0: i32) -> (i32, i32) {
    %c0_i32 = arith.constant 0 : i32
    %c0_i32_0 = arith.constant 0 : i32
    %c0_i32_1 = arith.constant 0 : i32
    return %c0_i32, %c0_i32_0 : i32, i32
  }
  func.func @transform_5(%arg0: i32) -> (i32, i32) {
    %c0_i32 = arith.constant 0 : i32
    %c0_i32_0 = arith.constant 0 : i32
    %c0_i32_1 = arith.constant 0 : i32
    return %c0_i32, %c0_i32_0 : i32, i32
  }
  func.func @transform_6(%arg0: i32) -> (i32, i32) {
    %c0_i32 = arith.constant 0 : i32
    %c0_i32_0 = arith.constant 0 : i32
    return %arg0, %c0_i32 : i32, i32
  }
}

module attributes {stable_mosaic.version = 11 : i64} {
  func.func @_layernorm_kernel(%arg0: i32, %arg1: memref<16x32xf32, #tpu.memory_space<vmem>>, %arg2: memref<1x32xf32, #tpu.memory_space<vmem>>, %arg3: memref<1x32xf32, #tpu.memory_space<vmem>>, %arg4: memref<16x32xbf16, #tpu.memory_space<vmem>>) attributes {dimension_semantics = [#tpu.dimension_semantics<parallel>], iteration_bounds = array<i64: 1>, scalar_prefetch = 0 : i64, scratch_operands = 0 : i64, tpu.core_type = #tpu.core_type<tc>, window_params = [{transform_indices = @transform_0, window_bounds = array<i64: 16, 32>}, {pipeline_mode = #tpu.pipeline_mode<synchronous>, transform_indices = @transform_1, window_bounds = array<i64: 1, 32>}, {pipeline_mode = #tpu.pipeline_mode<synchronous>, transform_indices = @transform_2, window_bounds = array<i64: 1, 32>}, {transform_indices = @transform_3, window_bounds = array<i64: 16, 32>}]} {
    %c0 = arith.constant 0 : index
    %c0_0 = arith.constant 0 : index
    %0 = vector.load %arg1[%c0, %c0_0] : memref<16x32xf32, #tpu.memory_space<vmem>>, vector<16x32xf32>
    %cst = arith.constant dense<0.000000e+00> : vector<16xf32>
    %1 = vector.multi_reduction <add>, %0, %cst [1] : vector<16x32xf32> to vector<16xf32>
    %2 = vector.shape_cast %1 : vector<16xf32> to vector<16x1xf32>
    %cst_1 = arith.constant 3.200000e+01 : f32
    %3 = vector.broadcast %cst_1 : f32 to vector<16x1xf32>
    %4 = arith.divf %2, %3 : vector<16x1xf32>
    %5 = arith.mulf %0, %0 : vector<16x32xf32>
    %cst_2 = arith.constant dense<0.000000e+00> : vector<16xf32>
    %6 = vector.multi_reduction <add>, %5, %cst_2 [1] : vector<16x32xf32> to vector<16xf32>
    %7 = vector.shape_cast %6 : vector<16xf32> to vector<16x1xf32>
    %cst_3 = arith.constant 3.200000e+01 : f32
    %8 = vector.broadcast %cst_3 : f32 to vector<16x1xf32>
    %9 = arith.divf %7, %8 : vector<16x1xf32>
    %10 = arith.mulf %4, %4 : vector<16x1xf32>
    %11 = arith.subf %9, %10 : vector<16x1xf32>
    %cst_4 = arith.constant 0.000000e+00 : f32
    %12 = vector.broadcast %cst_4 : f32 to vector<16x1xf32>
    %13 = arith.maximumf %11, %12 : vector<16x1xf32>
    %cst_5 = arith.constant 9.99999996E-13 : f32
    %14 = vector.broadcast %cst_5 : f32 to vector<16x1xf32>
    %15 = arith.addf %13, %14 : vector<16x1xf32>
    %16 = math.rsqrt %15 : vector<16x1xf32>
    %c0_6 = arith.constant 0 : index
    %c0_7 = arith.constant 0 : index
    %17 = vector.load %arg2[%c0_6, %c0_7] : memref<1x32xf32, #tpu.memory_space<vmem>>, vector<1x32xf32>
    %18 = vector.broadcast %16 : vector<16x1xf32> to vector<16x32xf32>
    %19 = vector.broadcast %17 : vector<1x32xf32> to vector<16x32xf32>
    %20 = arith.mulf %18, %19 : vector<16x32xf32>
    %21 = vector.broadcast %4 : vector<16x1xf32> to vector<16x32xf32>
    %22 = arith.subf %0, %21 : vector<16x32xf32>
    %23 = arith.mulf %22, %20 : vector<16x32xf32>
    %c0_8 = arith.constant 0 : index
    %c0_9 = arith.constant 0 : index
    %24 = vector.load %arg3[%c0_8, %c0_9] : memref<1x32xf32, #tpu.memory_space<vmem>>, vector<1x32xf32>
    %25 = vector.broadcast %24 : vector<1x32xf32> to vector<16x32xf32>
    %26 = arith.addf %23, %25 : vector<16x32xf32>
    %27 = arith.truncf %26 : vector<16x32xf32> to vector<16x32xbf16>
    %c0_10 = arith.constant 0 : index
    %c0_11 = arith.constant 0 : index
    %28 = vector.load %arg4[%c0_10, %c0_11] : memref<16x32xbf16, #tpu.memory_space<vmem>>, vector<16x32xbf16>
    tpu.vector_store %arg4[%c0_10, %c0_11], %27 {strides = array<i32>} : memref<16x32xbf16, #tpu.memory_space<vmem>>, vector<16x32xbf16>,
    return
  }
  func.func @transform_0(%arg0: i32) -> (i32, i32) {
    %c0_i32 = arith.constant 0 : i32
    %c0_i32_0 = arith.constant 0 : i32
    return %arg0, %c0_i32 : i32, i32
  }
  func.func @transform_1(%arg0: i32) -> (i32, i32) {
    %c0_i32 = arith.constant 0 : i32
    %c0_i32_0 = arith.constant 0 : i32
    %c0_i32_1 = arith.constant 0 : i32
    return %c0_i32, %c0_i32_0 : i32, i32
  }
  func.func @transform_2(%arg0: i32) -> (i32, i32) {
    %c0_i32 = arith.constant 0 : i32
    %c0_i32_0 = arith.constant 0 : i32
    %c0_i32_1 = arith.constant 0 : i32
    return %c0_i32, %c0_i32_0 : i32, i32
  }
  func.func @transform_3(%arg0: i32) -> (i32, i32) {
    %c0_i32 = arith.constant 0 : i32
    %c0_i32_0 = arith.constant 0 : i32
    return %arg0, %c0_i32 : i32, i32
  }
}

module attributes {stable_mosaic.version = 11 : i64} {
  func.func @_linear_kernel(%arg0: i32, %arg1: memref<16x32xbf16, #tpu.memory_space<vmem>>, %arg2: memref<32x64xbf16, #tpu.memory_space<vmem>>, %arg3: memref<1x64xf32, #tpu.memory_space<vmem>>, %arg4: memref<16x64xbf16, #tpu.memory_space<vmem>>) attributes {dimension_semantics = [#tpu.dimension_semantics<parallel>], iteration_bounds = array<i64: 1>, scalar_prefetch = 0 : i64, scratch_operands = 0 : i64, tpu.core_type = #tpu.core_type<tc>, window_params = [{transform_indices = @transform_0, window_bounds = array<i64: 16, 32>}, {pipeline_mode = #tpu.pipeline_mode<synchronous>, transform_indices = @transform_1, window_bounds = array<i64: 32, 64>}, {pipeline_mode = #tpu.pipeline_mode<synchronous>, transform_indices = @transform_2, window_bounds = array<i64: 1, 64>}, {transform_indices = @transform_3, window_bounds = array<i64: 16, 64>}]} {
    %c0 = arith.constant 0 : index
    %c0_0 = arith.constant 0 : index
    %0 = vector.load %arg1[%c0, %c0_0] : memref<16x32xbf16, #tpu.memory_space<vmem>>, vector<16x32xbf16>
    %c0_1 = arith.constant 0 : index
    %c0_2 = arith.constant 0 : index
    %1 = vector.load %arg2[%c0_1, %c0_2] : memref<32x64xbf16, #tpu.memory_space<vmem>>, vector<32x64xbf16>
    %cst = arith.constant dense<0.000000e+00> : vector<16x64xf32>
    %2 = tpu.matmul %0, %1, %cst {dimension_numbers = #tpu.dot_dimension_numbers<[1], [0], [0], [1], [0, 0, 1, 1], [], []>} : vector<16x32xbf16>, vector<32x64xbf16>, vector<16x64xf32> -> vector<16x64xf32>
    %c0_3 = arith.constant 0 : index
    %c0_4 = arith.constant 0 : index
    %3 = vector.load %arg3[%c0_3, %c0_4] : memref<1x64xf32, #tpu.memory_space<vmem>>, vector<1x64xf32>
    %4 = vector.broadcast %3 : vector<1x64xf32> to vector<16x64xf32>
    %5 = arith.addf %2, %4 : vector<16x64xf32>
    %6 = arith.mulf %5, %5 : vector<16x64xf32>
    %7 = arith.mulf %5, %6 : vector<16x64xf32>
    %cst_5 = arith.constant 4.471500e-02 : f32
    %8 = vector.broadcast %cst_5 : f32 to vector<16x64xf32>
    %9 = arith.mulf %8, %7 : vector<16x64xf32>
    %10 = arith.addf %5, %9 : vector<16x64xf32>
    %cst_6 = arith.constant 0.797884583 : f32
    %11 = vector.broadcast %cst_6 : f32 to vector<16x64xf32>
    %12 = arith.mulf %11, %10 : vector<16x64xf32>
    %13 = math.tanh %12 : vector<16x64xf32>
    %cst_7 = arith.constant 1.000000e+00 : f32
    %14 = vector.broadcast %cst_7 : f32 to vector<16x64xf32>
    %15 = arith.addf %14, %13 : vector<16x64xf32>
    %cst_8 = arith.constant 5.000000e-01 : f32
    %16 = vector.broadcast %cst_8 : f32 to vector<16x64xf32>
    %17 = arith.mulf %16, %15 : vector<16x64xf32>
    %18 = arith.mulf %5, %17 : vector<16x64xf32>
    %19 = arith.truncf %18 : vector<16x64xf32> to vector<16x64xbf16>
    %c0_9 = arith.constant 0 : index
    %c0_10 = arith.constant 0 : index
    %20 = vector.load %arg4[%c0_9, %c0_10] : memref<16x64xbf16, #tpu.memory_space<vmem>>, vector<16x64xbf16>
    tpu.vector_store %arg4[%c0_9, %c0_10], %19 {strides = array<i32>} : memref<16x64xbf16, #tpu.memory_space<vmem>>, vector<16x64xbf16>,
    return
  }
  func.func @transform_0(%arg0: i32) -> (i32, i32) {
    %c0_i32 = arith.constant 0 : i32
    %c0_i32_0 = arith.constant 0 : i32
    return %arg0, %c0_i32 : i32, i32
  }
  func.func @transform_1(%arg0: i32) -> (i32, i32) {
    %c0_i32 = arith.constant 0 : i32
    %c0_i32_0 = arith.constant 0 : i32
    %c0_i32_1 = arith.constant 0 : i32
    return %c0_i32, %c0_i32_0 : i32, i32
  }
  func.func @transform_2(%arg0: i32) -> (i32, i32) {
    %c0_i32 = arith.constant 0 : i32
    %c0_i32_0 = arith.constant 0 : i32
    %c0_i32_1 = arith.constant 0 : i32
    return %c0_i32, %c0_i32_0 : i32, i32
  }
  func.func @transform_3(%arg0: i32) -> (i32, i32) {
    %c0_i32 = arith.constant 0 : i32
    %c0_i32_0 = arith.constant 0 : i32
    return %arg0, %c0_i32 : i32, i32
  }
}

module attributes {stable_mosaic.version = 11 : i64} {
  func.func @_qkv_attention_kernel(%arg0: i32, %arg1: i32, %arg2: memref<1x8x32xbf16, #tpu.memory_space<vmem>>, %arg3: memref<1x32x96xbf16, #tpu.memory_space<vmem>>, %arg4: memref<1x1x96xf32, #tpu.memory_space<vmem>>, %arg5: memref<1x1x8xf32, #tpu.memory_space<vmem>>, %arg6: memref<1x8x32xbf16, #tpu.memory_space<vmem>>) attributes {dimension_semantics = [#tpu.dimension_semantics<parallel>, #tpu.dimension_semantics<parallel>], iteration_bounds = array<i64: 2, 1>, scalar_prefetch = 0 : i64, scratch_operands = 0 : i64, tpu.core_type = #tpu.core_type<tc>, window_params = [{transform_indices = @transform_0, window_bounds = array<i64: 1, 8, 32>}, {transform_indices = @transform_1, window_bounds = array<i64: 1, 32, 96>}, {transform_indices = @transform_2, window_bounds = array<i64: 1, 1, 96>}, {transform_indices = @transform_3, window_bounds = array<i64: 1, 1, 8>}, {transform_indices = @transform_4, window_bounds = array<i64: 1, 8, 32>}]} {
    %c0 = arith.constant 0 : index
    %c0_0 = arith.constant 0 : index
    %c0_1 = arith.constant 0 : index
    %0 = vector.load %arg2[%c0, %c0_0, %c0_1] : memref<1x8x32xbf16, #tpu.memory_space<vmem>>, vector<1x8x32xbf16>
    %1 = vector.shape_cast %0 : vector<1x8x32xbf16> to vector<8x32xbf16>
    %c0_2 = arith.constant 0 : index
    %c0_3 = arith.constant 0 : index
    %c0_4 = arith.constant 0 : index
    %2 = vector.load %arg3[%c0_2, %c0_3, %c0_4] : memref<1x32x96xbf16, #tpu.memory_space<vmem>>, vector<1x32x96xbf16>
    %3 = vector.shape_cast %2 : vector<1x32x96xbf16> to vector<32x96xbf16>
    %c0_5 = arith.constant 0 : index
    %c0_6 = arith.constant 0 : index
    %c0_7 = arith.constant 0 : index
    %4 = vector.load %arg5[%c0_5, %c0_6, %c0_7] : memref<1x1x8xf32, #tpu.memory_space<vmem>>, vector<1x1x8xf32>
    %5 = vector.shape_cast %4 : vector<1x1x8xf32> to vector<1x8xf32>
    %cst = arith.constant dense<0.000000e+00> : vector<8x96xf32>
    %6 = tpu.matmul %1, %3, %cst {dimension_numbers = #tpu.dot_dimension_numbers<[1], [0], [0], [1], [0, 0, 1, 1], [], []>} : vector<8x32xbf16>, vector<32x96xbf16>, vector<8x96xf32> -> vector<8x96xf32>
    %c0_8 = arith.constant 0 : index
    %c0_9 = arith.constant 0 : index
    %c0_10 = arith.constant 0 : index
    %7 = vector.load %arg4[%c0_8, %c0_9, %c0_10] : memref<1x1x96xf32, #tpu.memory_space<vmem>>, vector<1x1x96xf32>
    %8 = vector.shape_cast %7 : vector<1x1x96xf32> to vector<1x96xf32>
    %9 = vector.broadcast %8 : vector<1x96xf32> to vector<8x96xf32>
    %10 = arith.addf %6, %9 : vector<8x96xf32>
    %11 = vector.extract_strided_slice %10 {offsets = [0, 0], sizes = [8, 8], strides = [1, 1]} : vector<8x96xf32> to vector<8x8xf32>
    %cst_11 = arith.constant 0.353553385 : f32
    %12 = vector.broadcast %cst_11 : f32 to vector<8x8xf32>
    %13 = arith.mulf %11, %12 : vector<8x8xf32>
    %14 = arith.truncf %13 : vector<8x8xf32> to vector<8x8xbf16>
    %15 = vector.extract_strided_slice %10 {offsets = [0, 32], sizes = [8, 8], strides = [1, 1]} : vector<8x96xf32> to vector<8x8xf32>
    %16 = arith.truncf %15 : vector<8x8xf32> to vector<8x8xbf16>
    %17 = vector.extract_strided_slice %10 {offsets = [0, 64], sizes = [8, 8], strides = [1, 1]} : vector<8x96xf32> to vector<8x8xf32>
    %18 = arith.truncf %17 : vector<8x8xf32> to vector<8x8xbf16>
    %cst_12 = arith.constant dense<0.000000e+00> : vector<8x8xf32>
    %19 = tpu.matmul %14, %16, %cst_12 {dimension_numbers = #tpu.dot_dimension_numbers<[1], [1], [0], [0], [0, 0, 1, 0], [], []>} : vector<8x8xbf16>, vector<8x8xbf16>, vector<8x8xf32> -> vector<8x8xf32>
    %20 = vector.broadcast %5 : vector<1x8xf32> to vector<8x8xf32>
    %21 = arith.addf %19, %20 : vector<8x8xf32>
    %cst_13 = arith.constant dense<0xFF800000> : vector<8xf32>
    %22 = vector.multi_reduction <maximumf>, %21, %cst_13 [1] : vector<8x8xf32> to vector<8xf32>
    %23 = vector.shape_cast %22 : vector<8xf32> to vector<8x1xf32>
    %24 = vector.broadcast %23 : vector<8x1xf32> to vector<8x8xf32>
    %25 = arith.subf %21, %24 : vector<8x8xf32>
    %26 = math.exp %25 : vector<8x8xf32>
    %cst_14 = arith.constant dense<0.000000e+00> : vector<8xf32>
    %27 = vector.multi_reduction <add>, %26, %cst_14 [1] : vector<8x8xf32> to vector<8xf32>
    %28 = vector.shape_cast %27 : vector<8xf32> to vector<8x1xf32>
    %29 = tpu.reciprocal %28 {approx = true} : vector<8x1xf32> -> vector<8x1xf32>
    %30 = vector.broadcast %29 : vector<8x1xf32> to vector<8x8xf32>
    %31 = arith.mulf %26, %30 : vector<8x8xf32>
    %32 = arith.truncf %31 : vector<8x8xf32> to vector<8x8xbf16>
    %cst_15 = arith.constant dense<0.000000e+00> : vector<8x8xf32>
    %33 = tpu.matmul %32, %18, %cst_15 {dimension_numbers = #tpu.dot_dimension_numbers<[1], [0], [0], [1], [0, 0, 1, 1], [], []>} : vector<8x8xbf16>, vector<8x8xbf16>, vector<8x8xf32> -> vector<8x8xf32>
    %34 = arith.truncf %33 : vector<8x8xf32> to vector<8x8xbf16>
    %c0_16 = arith.constant 0 : index
    %c0_17 = arith.constant 0 : index
    %c0_18 = arith.constant 0 : index
    %35 = vector.load %arg6[%c0_16, %c0_17, %c0_18] : memref<1x8x32xbf16, #tpu.memory_space<vmem>>, vector<1x8x8xbf16>
    %36 = vector.shape_cast %35 : vector<1x8x8xbf16> to vector<8x8xbf16>
    %37 = vector.shape_cast %34 : vector<8x8xbf16> to vector<1x8x8xbf16>
    tpu.vector_store %arg6[%c0_16, %c0_17, %c0_18], %37 {strides = array<i32>} : memref<1x8x32xbf16, #tpu.memory_space<vmem>>, vector<1x8x8xbf16>,
    %38 = vector.extract_strided_slice %10 {offsets = [0, 8], sizes = [8, 8], strides = [1, 1]} : vector<8x96xf32> to vector<8x8xf32>
    %cst_19 = arith.constant 0.353553385 : f32
    %39 = vector.broadcast %cst_19 : f32 to vector<8x8xf32>
    %40 = arith.mulf %38, %39 : vector<8x8xf32>
    %41 = arith.truncf %40 : vector<8x8xf32> to vector<8x8xbf16>
    %42 = vector.extract_strided_slice %10 {offsets = [0, 40], sizes = [8, 8], strides = [1, 1]} : vector<8x96xf32> to vector<8x8xf32>
    %43 = arith.truncf %42 : vector<8x8xf32> to vector<8x8xbf16>
    %44 = vector.extract_strided_slice %10 {offsets = [0, 72], sizes = [8, 8], strides = [1, 1]} : vector<8x96xf32> to vector<8x8xf32>
    %45 = arith.truncf %44 : vector<8x8xf32> to vector<8x8xbf16>
    %cst_20 = arith.constant dense<0.000000e+00> : vector<8x8xf32>
    %46 = tpu.matmul %41, %43, %cst_20 {dimension_numbers = #tpu.dot_dimension_numbers<[1], [1], [0], [0], [0, 0, 1, 0], [], []>} : vector<8x8xbf16>, vector<8x8xbf16>, vector<8x8xf32> -> vector<8x8xf32>
    %47 = vector.broadcast %5 : vector<1x8xf32> to vector<8x8xf32>
    %48 = arith.addf %46, %47 : vector<8x8xf32>
    %cst_21 = arith.constant dense<0xFF800000> : vector<8xf32>
    %49 = vector.multi_reduction <maximumf>, %48, %cst_21 [1] : vector<8x8xf32> to vector<8xf32>
    %50 = vector.shape_cast %49 : vector<8xf32> to vector<8x1xf32>
    %51 = vector.broadcast %50 : vector<8x1xf32> to vector<8x8xf32>
    %52 = arith.subf %48, %51 : vector<8x8xf32>
    %53 = math.exp %52 : vector<8x8xf32>
    %cst_22 = arith.constant dense<0.000000e+00> : vector<8xf32>
    %54 = vector.multi_reduction <add>, %53, %cst_22 [1] : vector<8x8xf32> to vector<8xf32>
    %55 = vector.shape_cast %54 : vector<8xf32> to vector<8x1xf32>
    %56 = tpu.reciprocal %55 {approx = true} : vector<8x1xf32> -> vector<8x1xf32>
    %57 = vector.broadcast %56 : vector<8x1xf32> to vector<8x8xf32>
    %58 = arith.mulf %53, %57 : vector<8x8xf32>
    %59 = arith.truncf %58 : vector<8x8xf32> to vector<8x8xbf16>
    %cst_23 = arith.constant dense<0.000000e+00> : vector<8x8xf32>
    %60 = tpu.matmul %59, %45, %cst_23 {dimension_numbers = #tpu.dot_dimension_numbers<[1], [0], [0], [1], [0, 0, 1, 1], [], []>} : vector<8x8xbf16>, vector<8x8xbf16>, vector<8x8xf32> -> vector<8x8xf32>
    %61 = arith.truncf %60 : vector<8x8xf32> to vector<8x8xbf16>
    %c0_24 = arith.constant 0 : index
    %c0_25 = arith.constant 0 : index
    %c8 = arith.constant 8 : index
    %62 = vector.load %arg6[%c0_24, %c0_25, %c8] : memref<1x8x32xbf16, #tpu.memory_space<vmem>>, vector<1x8x8xbf16>
    %63 = vector.shape_cast %62 : vector<1x8x8xbf16> to vector<8x8xbf16>
    %64 = vector.shape_cast %61 : vector<8x8xbf16> to vector<1x8x8xbf16>
    tpu.vector_store %arg6[%c0_24, %c0_25, %c8], %64 {strides = array<i32>} : memref<1x8x32xbf16, #tpu.memory_space<vmem>>, vector<1x8x8xbf16>,
    %65 = vector.extract_strided_slice %10 {offsets = [0, 16], sizes = [8, 8], strides = [1, 1]} : vector<8x96xf32> to vector<8x8xf32>
    %cst_26 = arith.constant 0.353553385 : f32
    %66 = vector.broadcast %cst_26 : f32 to vector<8x8xf32>
    %67 = arith.mulf %65, %66 : vector<8x8xf32>
    %68 = arith.truncf %67 : vector<8x8xf32> to vector<8x8xbf16>
    %69 = vector.extract_strided_slice %10 {offsets = [0, 48], sizes = [8, 8], strides = [1, 1]} : vector<8x96xf32> to vector<8x8xf32>
    %70 = arith.truncf %69 : vector<8x8xf32> to vector<8x8xbf16>
    %71 = vector.extract_strided_slice %10 {offsets = [0, 80], sizes = [8, 8], strides = [1, 1]} : vector<8x96xf32> to vector<8x8xf32>
    %72 = arith.truncf %71 : vector<8x8xf32> to vector<8x8xbf16>
    %cst_27 = arith.constant dense<0.000000e+00> : vector<8x8xf32>
    %73 = tpu.matmul %68, %70, %cst_27 {dimension_numbers = #tpu.dot_dimension_numbers<[1], [1], [0], [0], [0, 0, 1, 0], [], []>} : vector<8x8xbf16>, vector<8x8xbf16>, vector<8x8xf32> -> vector<8x8xf32>
    %74 = vector.broadcast %5 : vector<1x8xf32> to vector<8x8xf32>
    %75 = arith.addf %73, %74 : vector<8x8xf32>
    %cst_28 = arith.constant dense<0xFF800000> : vector<8xf32>
    %76 = vector.multi_reduction <maximumf>, %75, %cst_28 [1] : vector<8x8xf32> to vector<8xf32>
    %77 = vector.shape_cast %76 : vector<8xf32> to vector<8x1xf32>
    %78 = vector.broadcast %77 : vector<8x1xf32> to vector<8x8xf32>
    %79 = arith.subf %75, %78 : vector<8x8xf32>
    %80 = math.exp %79 : vector<8x8xf32>
    %cst_29 = arith.constant dense<0.000000e+00> : vector<8xf32>
    %81 = vector.multi_reduction <add>, %80, %cst_29 [1] : vector<8x8xf32> to vector<8xf32>
    %82 = vector.shape_cast %81 : vector<8xf32> to vector<8x1xf32>
    %83 = tpu.reciprocal %82 {approx = true} : vector<8x1xf32> -> vector<8x1xf32>
    %84 = vector.broadcast %83 : vector<8x1xf32> to vector<8x8xf32>
    %85 = arith.mulf %80, %84 : vector<8x8xf32>
    %86 = arith.truncf %85 : vector<8x8xf32> to vector<8x8xbf16>
    %cst_30 = arith.constant dense<0.000000e+00> : vector<8x8xf32>
    %87 = tpu.matmul %86, %72, %cst_30 {dimension_numbers = #tpu.dot_dimension_numbers<[1], [0], [0], [1], [0, 0, 1, 1], [], []>} : vector<8x8xbf16>, vector<8x8xbf16>, vector<8x8xf32> -> vector<8x8xf32>
    %88 = arith.truncf %87 : vector<8x8xf32> to vector<8x8xbf16>
    %c0_31 = arith.constant 0 : index
    %c0_32 = arith.constant 0 : index
    %c16 = arith.constant 16 : index
    %89 = vector.load %arg6[%c0_31, %c0_32, %c16] : memref<1x8x32xbf16, #tpu.memory_space<vmem>>, vector<1x8x8xbf16>
    %90 = vector.shape_cast %89 : vector<1x8x8xbf16> to vector<8x8xbf16>
    %91 = vector.shape_cast %88 : vector<8x8xbf16> to vector<1x8x8xbf16>
    tpu.vector_store %arg6[%c0_31, %c0_32, %c16], %91 {strides = array<i32>} : memref<1x8x32xbf16, #tpu.memory_space<vmem>>, vector<1x8x8xbf16>,
    %92 = vector.extract_strided_slice %10 {offsets = [0, 24], sizes = [8, 8], strides = [1, 1]} : vector<8x96xf32> to vector<8x8xf32>
    %cst_33 = arith.constant 0.353553385 : f32
    %93 = vector.broadcast %cst_33 : f32 to vector<8x8xf32>
    %94 = arith.mulf %92, %93 : vector<8x8xf32>
    %95 = arith.truncf %94 : vector<8x8xf32> to vector<8x8xbf16>
    %96 = vector.extract_strided_slice %10 {offsets = [0, 56], sizes = [8, 8], strides = [1, 1]} : vector<8x96xf32> to vector<8x8xf32>
    %97 = arith.truncf %96 : vector<8x8xf32> to vector<8x8xbf16>
    %98 = vector.extract_strided_slice %10 {offsets = [0, 88], sizes = [8, 8], strides = [1, 1]} : vector<8x96xf32> to vector<8x8xf32>
    %99 = arith.truncf %98 : vector<8x8xf32> to vector<8x8xbf16>
    %cst_34 = arith.constant dense<0.000000e+00> : vector<8x8xf32>
    %100 = tpu.matmul %95, %97, %cst_34 {dimension_numbers = #tpu.dot_dimension_numbers<[1], [1], [0], [0], [0, 0, 1, 0], [], []>} : vector<8x8xbf16>, vector<8x8xbf16>, vector<8x8xf32> -> vector<8x8xf32>
    %101 = vector.broadcast %5 : vector<1x8xf32> to vector<8x8xf32>
    %102 = arith.addf %100, %101 : vector<8x8xf32>
    %cst_35 = arith.constant dense<0xFF800000> : vector<8xf32>
    %103 = vector.multi_reduction <maximumf>, %102, %cst_35 [1] : vector<8x8xf32> to vector<8xf32>
    %104 = vector.shape_cast %103 : vector<8xf32> to vector<8x1xf32>
    %105 = vector.broadcast %104 : vector<8x1xf32> to vector<8x8xf32>
    %106 = arith.subf %102, %105 : vector<8x8xf32>
    %107 = math.exp %106 : vector<8x8xf32>
    %cst_36 = arith.constant dense<0.000000e+00> : vector<8xf32>
    %108 = vector.multi_reduction <add>, %107, %cst_36 [1] : vector<8x8xf32> to vector<8xf32>
    %109 = vector.shape_cast %108 : vector<8xf32> to vector<8x1xf32>
    %110 = tpu.reciprocal %109 {approx = true} : vector<8x1xf32> -> vector<8x1xf32>
    %111 = vector.broadcast %110 : vector<8x1xf32> to vector<8x8xf32>
    %112 = arith.mulf %107, %111 : vector<8x8xf32>
    %113 = arith.truncf %112 : vector<8x8xf32> to vector<8x8xbf16>
    %cst_37 = arith.constant dense<0.000000e+00> : vector<8x8xf32>
    %114 = tpu.matmul %113, %99, %cst_37 {dimension_numbers = #tpu.dot_dimension_numbers<[1], [0], [0], [1], [0, 0, 1, 1], [], []>} : vector<8x8xbf16>, vector<8x8xbf16>, vector<8x8xf32> -> vector<8x8xf32>
    %115 = arith.truncf %114 : vector<8x8xf32> to vector<8x8xbf16>
    %c0_38 = arith.constant 0 : index
    %c0_39 = arith.constant 0 : index
    %c24 = arith.constant 24 : index
    %116 = vector.load %arg6[%c0_38, %c0_39, %c24] : memref<1x8x32xbf16, #tpu.memory_space<vmem>>, vector<1x8x8xbf16>
    %117 = vector.shape_cast %116 : vector<1x8x8xbf16> to vector<8x8xbf16>
    %118 = vector.shape_cast %115 : vector<8x8xbf16> to vector<1x8x8xbf16>
    tpu.vector_store %arg6[%c0_38, %c0_39, %c24], %118 {strides = array<i32>} : memref<1x8x32xbf16, #tpu.memory_space<vmem>>, vector<1x8x8xbf16>,
    return
  }
  func.func @transform_0(%arg0: i32, %arg1: i32) -> (i32, i32, i32) {
    %c0_i32 = arith.constant 0 : i32
    %c0_i32_0 = arith.constant 0 : i32
    %c0_i32_1 = arith.constant 0 : i32
    return %arg0, %c0_i32, %c0_i32_0 : i32, i32, i32
  }
  func.func @transform_1(%arg0: i32, %arg1: i32) -> (i32, i32, i32) {
    %c0_i32 = arith.constant 0 : i32
    %c0_i32_0 = arith.constant 0 : i32
    %c0_i32_1 = arith.constant 0 : i32
    return %arg1, %c0_i32, %c0_i32_0 : i32, i32, i32
  }
  func.func @transform_2(%arg0: i32, %arg1: i32) -> (i32, i32, i32) {
    %c0_i32 = arith.constant 0 : i32
    %c0_i32_0 = arith.constant 0 : i32
    %c0_i32_1 = arith.constant 0 : i32
    return %arg1, %c0_i32, %c0_i32_0 : i32, i32, i32
  }
  func.func @transform_3(%arg0: i32, %arg1: i32) -> (i32, i32, i32) {
    %c0_i32 = arith.constant 0 : i32
    %c0_i32_0 = arith.constant 0 : i32
    %c0_i32_1 = arith.constant 0 : i32
    return %arg0, %c0_i32, %c0_i32_0 : i32, i32, i32
  }
  func.func @transform_4(%arg0: i32, %arg1: i32) -> (i32, i32, i32) {
    %c0_i32 = arith.constant 0 : i32
    %c0_i32_0 = arith.constant 0 : i32
    return %arg0, %c0_i32, %arg1 : i32, i32, i32
  }
}

module attributes {stable_mosaic.version = 11 : i64} {
  func.func @_linear_residual_ln_kernel(%arg0: i32, %arg1: memref<16x64xbf16, #tpu.memory_space<vmem>>, %arg2: memref<64x32xbf16, #tpu.memory_space<vmem>>, %arg3: memref<1x32xf32, #tpu.memory_space<vmem>>, %arg4: memref<16x32xbf16, #tpu.memory_space<vmem>>, %arg5: memref<1x32xf32, #tpu.memory_space<vmem>>, %arg6: memref<1x32xf32, #tpu.memory_space<vmem>>, %arg7: memref<16x32xbf16, #tpu.memory_space<vmem>>) attributes {dimension_semantics = [#tpu.dimension_semantics<parallel>], iteration_bounds = array<i64: 1>, scalar_prefetch = 0 : i64, scratch_operands = 0 : i64, tpu.core_type = #tpu.core_type<tc>, window_params = [{transform_indices = @transform_0, window_bounds = array<i64: 16, 64>}, {pipeline_mode = #tpu.pipeline_mode<synchronous>, transform_indices = @transform_1, window_bounds = array<i64: 64, 32>}, {pipeline_mode = #tpu.pipeline_mode<synchronous>, transform_indices = @transform_2, window_bounds = array<i64: 1, 32>}, {transform_indices = @transform_3, window_bounds = array<i64: 16, 32>}, {pipeline_mode = #tpu.pipeline_mode<synchronous>, transform_indices = @transform_4, window_bounds = array<i64: 1, 32>}, {pipeline_mode = #tpu.pipeline_mode<synchronous>, transform_indices = @transform_5, window_bounds = array<i64: 1, 32>}, {transform_indices = @transform_6, window_bounds = array<i64: 16, 32>}]} {
    %c0 = arith.constant 0 : index
    %c0_0 = arith.constant 0 : index
    %0 = vector.load %arg1[%c0, %c0_0] : memref<16x64xbf16, #tpu.memory_space<vmem>>, vector<16x64xbf16>
    %c0_1 = arith.constant 0 : index
    %c0_2 = arith.constant 0 : index
    %1 = vector.load %arg2[%c0_1, %c0_2] : memref<64x32xbf16, #tpu.memory_space<vmem>>, vector<64x32xbf16>
    %cst = arith.constant dense<0.000000e+00> : vector<16x32xf32>
    %2 = tpu.matmul %0, %1, %cst {dimension_numbers = #tpu.dot_dimension_numbers<[1], [0], [0], [1], [0, 0, 1, 1], [], []>} : vector<16x64xbf16>, vector<64x32xbf16>, vector<16x32xf32> -> vector<16x32xf32>
    %c0_3 = arith.constant 0 : index
    %c0_4 = arith.constant 0 : index
    %3 = vector.load %arg3[%c0_3, %c0_4] : memref<1x32xf32, #tpu.memory_space<vmem>>, vector<1x32xf32>
    %4 = vector.broadcast %3 : vector<1x32xf32> to vector<16x32xf32>
    %5 = arith.addf %2, %4 : vector<16x32xf32>
    %c0_5 = arith.constant 0 : index
    %c0_6 = arith.constant 0 : index
    %6 = vector.load %arg4[%c0_5, %c0_6] : memref<16x32xbf16, #tpu.memory_space<vmem>>, vector<16x32xbf16>
    %7 = arith.extf %6 : vector<16x32xbf16> to vector<16x32xf32>
    %8 = arith.addf %5, %7 : vector<16x32xf32>
    %cst_7 = arith.constant dense<0.000000e+00> : vector<16xf32>
    %9 = vector.multi_reduction <add>, %8, %cst_7 [1] : vector<16x32xf32> to vector<16xf32>
    %10 = vector.shape_cast %9 : vector<16xf32> to vector<16x1xf32>
    %cst_8 = arith.constant 3.200000e+01 : f32
    %11 = vector.broadcast %cst_8 : f32 to vector<16x1xf32>
    %12 = arith.divf %10, %11 : vector<16x1xf32>
    %13 = arith.mulf %8, %8 : vector<16x32xf32>
    %cst_9 = arith.constant dense<0.000000e+00> : vector<16xf32>
    %14 = vector.multi_reduction <add>, %13, %cst_9 [1] : vector<16x32xf32> to vector<16xf32>
    %15 = vector.shape_cast %14 : vector<16xf32> to vector<16x1xf32>
    %cst_10 = arith.constant 3.200000e+01 : f32
    %16 = vector.broadcast %cst_10 : f32 to vector<16x1xf32>
    %17 = arith.divf %15, %16 : vector<16x1xf32>
    %18 = arith.mulf %12, %12 : vector<16x1xf32>
    %19 = arith.subf %17, %18 : vector<16x1xf32>
    %cst_11 = arith.constant 0.000000e+00 : f32
    %20 = vector.broadcast %cst_11 : f32 to vector<16x1xf32>
    %21 = arith.maximumf %19, %20 : vector<16x1xf32>
    %cst_12 = arith.constant 9.99999996E-13 : f32
    %22 = vector.broadcast %cst_12 : f32 to vector<16x1xf32>
    %23 = arith.addf %21, %22 : vector<16x1xf32>
    %24 = math.rsqrt %23 : vector<16x1xf32>
    %c0_13 = arith.constant 0 : index
    %c0_14 = arith.constant 0 : index
    %25 = vector.load %arg5[%c0_13, %c0_14] : memref<1x32xf32, #tpu.memory_space<vmem>>, vector<1x32xf32>
    %26 = vector.broadcast %24 : vector<16x1xf32> to vector<16x32xf32>
    %27 = vector.broadcast %25 : vector<1x32xf32> to vector<16x32xf32>
    %28 = arith.mulf %26, %27 : vector<16x32xf32>
    %29 = vector.broadcast %12 : vector<16x1xf32> to vector<16x32xf32>
    %30 = arith.subf %8, %29 : vector<16x32xf32>
    %31 = arith.mulf %30, %28 : vector<16x32xf32>
    %c0_15 = arith.constant 0 : index
    %c0_16 = arith.constant 0 : index
    %32 = vector.load %arg6[%c0_15, %c0_16] : memref<1x32xf32, #tpu.memory_space<vmem>>, vector<1x32xf32>
    %33 = vector.broadcast %32 : vector<1x32xf32> to vector<16x32xf32>
    %34 = arith.addf %31, %33 : vector<16x32xf32>
    %35 = arith.truncf %34 : vector<16x32xf32> to vector<16x32xbf16>
    %c0_17 = arith.constant 0 : index
    %c0_18 = arith.constant 0 : index
    %36 = vector.load %arg7[%c0_17, %c0_18] : memref<16x32xbf16, #tpu.memory_space<vmem>>, vector<16x32xbf16>
    tpu.vector_store %arg7[%c0_17, %c0_18], %35 {strides = array<i32>} : memref<16x32xbf16, #tpu.memory_space<vmem>>, vector<16x32xbf16>,
    return
  }
  func.func @transform_0(%arg0: i32) -> (i32, i32) {
    %c0_i32 = arith.constant 0 : i32
    %c0_i32_0 = arith.constant 0 : i32
    return %arg0, %c0_i32 : i32, i32
  }
  func.func @transform_1(%arg0: i32) -> (i32, i32) {
    %c0_i32 = arith.constant 0 : i32
    %c0_i32_0 = arith.constant 0 : i32
    %c0_i32_1 = arith.constant 0 : i32
    return %c0_i32, %c0_i32_0 : i32, i32
  }
  func.func @transform_2(%arg0: i32) -> (i32, i32) {
    %c0_i32 = arith.constant 0 : i32
    %c0_i32_0 = arith.constant 0 : i32
    %c0_i32_1 = arith.constant 0 : i32
    return %c0_i32, %c0_i32_0 : i32, i32
  }
  func.func @transform_3(%arg0: i32) -> (i32, i32) {
    %c0_i32 = arith.constant 0 : i32
    %c0_i32_0 = arith.constant 0 : i32
    return %arg0, %c0_i32 : i32, i32
  }
  func.func @transform_4(%arg0: i32) -> (i32, i32) {
    %c0_i32 = arith.constant 0 : i32
    %c0_i32_0 = arith.constant 0 : i32
    %c0_i32_1 = arith.constant 0 : i32
    return %c0_i32, %c0_i32_0 : i32, i32
  }
  func.func @transform_5(%arg0: i32) -> (i32, i32) {
    %c0_i32 = arith.constant 0 : i32
    %c0_i32_0 = arith.constant 0 : i32
    %c0_i32_1 = arith.constant 0 : i32
    return %c0_i32, %c0_i32_0 : i32, i32
  }
  func.func @transform_6(%arg0: i32) -> (i32, i32) {
    %c0_i32 = arith.constant 0 : i32
    %c0_i32_0 = arith.constant 0 : i32
    return %arg0, %c0_i32 : i32, i32
  }
}

module attributes {stable_mosaic.version = 11 : i64} {
  func.func @_pool_normalize_kernel(%arg0: i32, %arg1: memref<2x8x32xbf16, #tpu.memory_space<vmem>>, %arg2: memref<2x8xf32, #tpu.memory_space<vmem>>, %arg3: memref<2x32xf32, #tpu.memory_space<vmem>>) attributes {dimension_semantics = [#tpu.dimension_semantics<parallel>], iteration_bounds = array<i64: 1>, scalar_prefetch = 0 : i64, scratch_operands = 0 : i64, tpu.core_type = #tpu.core_type<tc>, window_params = [{transform_indices = @transform_0, window_bounds = array<i64: 2, 8, 32>}, {transform_indices = @transform_1, window_bounds = array<i64: 2, 8>}, {transform_indices = @transform_2, window_bounds = array<i64: 2, 32>}]} {
    %c0 = arith.constant 0 : index
    %c0_0 = arith.constant 0 : index
    %c0_1 = arith.constant 0 : index
    %0 = vector.load %arg1[%c0, %c0_0, %c0_1] : memref<2x8x32xbf16, #tpu.memory_space<vmem>>, vector<2x8x32xbf16>
    %1 = arith.extf %0 : vector<2x8x32xbf16> to vector<2x8x32xf32>
    %c0_2 = arith.constant 0 : index
    %c0_3 = arith.constant 0 : index
    %2 = vector.load %arg2[%c0_2, %c0_3] : memref<2x8xf32, #tpu.memory_space<vmem>>, vector<2x8xf32>
    %3 = vector.shape_cast %2 : vector<2x8xf32> to vector<2x8x1xf32>
    %4 = vector.broadcast %3 : vector<2x8x1xf32> to vector<2x8x32xf32>
    %5 = arith.mulf %1, %4 : vector<2x8x32xf32>
    %cst = arith.constant dense<0.000000e+00> : vector<2x32xf32>
    %6 = vector.multi_reduction <add>, %5, %cst [1] : vector<2x8x32xf32> to vector<2x32xf32>
    %cst_4 = arith.constant dense<0.000000e+00> : vector<2xf32>
    %7 = vector.multi_reduction <add>, %2, %cst_4 [1] : vector<2x8xf32> to vector<2xf32>
    %8 = vector.shape_cast %7 : vector<2xf32> to vector<2x1xf32>
    %cst_5 = arith.constant 9.99999971E-10 : f32
    %9 = vector.broadcast %cst_5 : f32 to vector<2x1xf32>
    %10 = arith.maximumf %8, %9 : vector<2x1xf32>
    %11 = tpu.reciprocal %10 {approx = true} : vector<2x1xf32> -> vector<2x1xf32>
    %12 = vector.broadcast %11 : vector<2x1xf32> to vector<2x32xf32>
    %13 = arith.mulf %6, %12 : vector<2x32xf32>
    %14 = arith.mulf %13, %13 : vector<2x32xf32>
    %cst_6 = arith.constant dense<0.000000e+00> : vector<2xf32>
    %15 = vector.multi_reduction <add>, %14, %cst_6 [1] : vector<2x32xf32> to vector<2xf32>
    %16 = vector.shape_cast %15 : vector<2xf32> to vector<2x1xf32>
    %17 = math.sqrt %16 : vector<2x1xf32>
    %cst_7 = arith.constant 9.99999996E-13 : f32
    %18 = vector.broadcast %cst_7 : f32 to vector<2x1xf32>
    %19 = arith.maximumf %17, %18 : vector<2x1xf32>
    %20 = vector.broadcast %19 : vector<2x1xf32> to vector<2x32xf32>
    %21 = arith.divf %13, %20 : vector<2x32xf32>
    %c0_8 = arith.constant 0 : index
    %c0_9 = arith.constant 0 : index
    %22 = vector.load %arg3[%c0_8, %c0_9] : memref<2x32xf32, #tpu.memory_space<vmem>>, vector<2x32xf32>
    tpu.vector_store %arg3[%c0_8, %c0_9], %21 {strides = array<i32>} : memref<2x32xf32, #tpu.memory_space<vmem>>, vector<2x32xf32>,
    return
  }
  func.func @transform_0(%arg0: i32) -> (i32, i32, i32) {
    %c0_i32 = arith.constant 0 : i32
    %c0_i32_0 = arith.constant 0 : i32
    %c0_i32_1 = arith.constant 0 : i32
    return %arg0, %c0_i32, %c0_i32_0 : i32, i32, i32
  }
  func.func @transform_1(%arg0: i32) -> (i32, i32) {
    %c0_i32 = arith.constant 0 : i32
    %c0_i32_0 = arith.constant 0 : i32
    return %arg0, %c0_i32 : i32, i32
  }
  func.func @transform_2(%arg0: i32) -> (i32, i32) {
    %c0_i32 = arith.constant 0 : i32
    %c0_i32_0 = arith.constant 0 : i32
    return %arg0, %c0_i32 : i32, i32
  }
}

</mosaic_0001>

<bundles_post_ra>
// kernel: gist_minilm_forward.13
= control target key start
LH: loop header
LB: loop body
LE: loop exit
PB: predicated region body
PF: predicated region fallthrough
CT: control target
= control target key end

     0   :  { %v152_v0 = vmov 0.0   ;;  %vm153_vm0 = vmmov 0   ;;  %vm45_vm1 = vcmask 261120   ;;  %vm116_vm2 = vcmask 519168   ;;  %s192_s1 = inlined_call_operand.vmem [shape: bf16[32,64], index: 1, kind: input, shape index: {}]   ;;  %s193_s0 = inlined_call_operand.vmem [shape: bf16[16,32], index: 0, kind: input, shape index: {}]   ;;  %s194_s2 = inlined_call_operand.vmem [shape: f32[1,64], index: 2, kind: input, shape index: {}]   ;;  %s195_s3 = inlined_call_operand.vmem [shape: bf16[16,64], index: 3, kind: output, shape index: {}]  }
   0x1   :  { %135 = vmatprep.subr.bf16.mxu0 %v152_v0  ;;  %v145_v1 = vld [vmem:[%s192_s1] sm:$0xff]   ;;  %139 = vmatprep.mubr.msk.bf16.mxu0 %vm153_vm0, %v152_v0  ;;  %v146_v2 = vld [vmem:[%s192_s1 + $0x8] sm:$0xff]  }
   0x2   :  { %136 = vmatpush3.bf16.msra.mxu0 %v145_v1  ;;  %v147_v3 = vld [vmem:[%s193_s0] sm:$0xff]  }
   0x3   :  { %137 = vmatprep.subr.bf16.mxu0 %v152_v0  ;;  %v123_v4 = vld [vmem:[%s194_s2] ss:$0 sm:$0xff] }
   0x6   :  { %138 = vmatpush3.bf16.msra.mxu0 %v146_v2 }
   0x9   :  { %140 = vmatmul.mubr.msk.bf16.vlgmr.msra.gmra.mrb[0].mxu0 %vm45_vm1, %v147_v3 }
  0xdc   :  { %v83_v5 = vpop.f32.mrb[0].mxu0 }
  0xdd   :  { %v84_v6 = vadd.f32 %v123_v4, %v83_v5  ;;  %v141_v7 = vpop.f32.mrb[1].mxu0 }
  0xde   :  { %v86_v8 = vpop.f32.mrb[2].mxu0 }
  0xdf   :  { %v90_v9 = vmul.f32 %v84_v6, %v84_v6  ;;  %v87_v10 = vadd.f32 %v123_v4, %v86_v8  ;;  %v142_v11 = vpop.f32.mrb[3].mxu0 }
  0xe1   :  { %v92_v12 = vmul.f32 %v90_v9, %v84_v6  ;;  %v91_v13 = vmul.f32 %v87_v10, %v87_v10 }
  0xe3   :  { %v94_v14 = vmul.f32 0.044715, %v92_v12  ;;  %v93_v15 = vmul.f32 %v91_v13, %v87_v10 }
  0xe5   :  { %v96_v16 = vadd.f32 %v94_v14, %v84_v6  ;;  %v95_v17 = vmul.f32 0.044715, %v93_v15 }
  0xe7   :  { %v98_v18 = vmul.f32 0.7978846, %v96_v16  ;;  %v97_v19 = vadd.f32 %v95_v17, %v87_v10 }
  0xe9   :  { %148 = vtanh.f32 %v98_v18  ;;  %v99_v20 = vmul.f32 0.7978846, %v97_v19 }
  0xeb   :  { %150 = vtanh.f32 %v99_v20 }
  0xf3   :  { %v149_v21 = vpop.eup %148 }
  0xf4   :  { %v102_v22 = vadd.f32 1.0, %v149_v21 }
  0xf5   :  { %v151_v23 = vpop.eup %150 }
  0xf6   :  { %v104_v24 = vmul.f32 0.5, %v102_v22  ;;  %v103_v25 = vadd.f32 1.0, %v151_v23 }
  0xf8   :  { %v106_v26 = vmul.f32 %v104_v24, %v84_v6  ;;  %v105_v27 = vmul.f32 0.5, %v103_v25 }
  0xfa   :  { %v130_v28 = vpack.c.bf16 %v106_v26, %v106_v26  ;;  %v107_v29 = vmul.f32 %v105_v27, %v87_v10 }
  0xfc   :  { %117 = vst.msk [vmem:[%s195_s3] sm:$0xf] %vm116_vm2, %v130_v28  ;;  %v131_v30 = vpack.c.bf16 %v107_v29, %v107_v29 }
  0xfe   :  { %118 = vst.msk [vmem:[%s195_s3 + $0x4] sm:$0xf] %vm116_vm2, %v131_v30 }

// kernel: gist_minilm_forward.10
= control target key start
LH: loop header
LB: loop body
LE: loop exit
PB: predicated region body
PF: predicated region fallthrough
CT: control target
= control target key end

     0   :  { %vm16_vm0 = vcmask 261120   ;;  %vm76_vm1 = vcmask 257024   ;;  %s131_s0 = inlined_call_operand.vmem [shape: f32[16,32], index: 0, kind: input, shape index: {}]   ;;  %s132_s1 = inlined_call_operand.vmem [shape: f32[1,32], index: 1, kind: input, shape index: {}]   ;;  %s133_s2 = inlined_call_operand.vmem [shape: f32[1,32], index: 2, kind: input, shape index: {}]   ;;  %s134_s3 = inlined_call_operand.vmem [shape: bf16[16,32], index: 3, kind: output, shape index: {}]  }
   0x1   :  { %v14_v0 = vld [vmem:[%s131_s0] sm:$0xff]  ;;  %v15_v1 = vld [vmem:[%s131_s0 + $0x8] sm:$0xff] }
   0x2   :  { %v17_v2 = vsel %vm16_vm0, %v14_v0, 0.0  ;;  %v26_v3 = vmul.f32 %v14_v0, %v14_v0  ;;  %v27_v4 = vmul.f32 %v15_v1, %v15_v1  ;;  %v20_v6 = vsel %vm16_vm0, %v15_v1, 0.0  ;;  %v83_v24 = vld [vmem:[%s132_s1] ss:$0 sm:$0xff] }
   0x3   :  { %18 = vadd.xlane.f32.xlu0 %v17_v2  ;;  %v84_v28 = vld [vmem:[%s133_s2] ss:$0 sm:$0xff] }
   0x4   :  { %v28_v5 = vsel %vm16_vm0, %v26_v3, 0.0  ;;  %v31_v7 = vsel %vm16_vm0, %v27_v4, 0.0 }
   0x5   :  { %29 = vadd.xlane.f32.xlu1 %v28_v5 }
   0x7   :  { %21 = vadd.xlane.f32.xlu0 %v20_v6 }
   0x9   :  { %32 = vadd.xlane.f32.xlu1 %v31_v7 }
  0x90   :  { %v19_v8 = vpop.xlane.xlu0 %18 }
  0x91   :  { %v24_v9 = vmul.f32 0.03125, %v19_v8 }
  0x92   :  { %v30_v10 = vpop.xlane.xlu1 %29 }
  0x93   :  { %v36_v11 = vmul.f32 %v24_v9, %v24_v9  ;;  %v34_v12 = vmul.f32 0.03125, %v30_v10  ;;  %v55_v26 = vsub.f32 %v14_v0, %v24_v9 }
  0x94   :  { %v22_v13 = vpop.xlane.xlu0 %21 }
  0x95   :  { %v38_v14 = vsub.f32 %v34_v12, %v36_v11  ;;  %v25_v15 = vmul.f32 0.03125, %v22_v13 }
  0x96   :  { %v33_v16 = vpop.xlane.xlu1 %32 }
  0x97   :  { %v40_v17 = vmax.f32 %v38_v14, 0.0  ;;  %v37_v18 = vmul.f32 %v25_v15, %v25_v15  ;;  %v35_v19 = vmul.f32 0.03125, %v33_v16  ;;  %v56_v32 = vsub.f32 %v15_v1, %v25_v15 }
  0x99   :  { %v42_v20 = vadd.f32 1e-12, %v40_v17  ;;  %v39_v21 = vsub.f32 %v35_v19, %v37_v18 }
  0x9b   :  { %89 = vrsqrt.f32 %v42_v20  ;;  %v41_v22 = vmax.f32 %v39_v21, 0.0 }
  0x9d   :  { %v43_v23 = vadd.f32 1e-12, %v41_v22 }
  0x9f   :  { %91 = vrsqrt.f32 %v43_v23 }
  0xa5   :  { %v90_v25 = vpop.eup %89 }
  0xa6   :  { %v53_v27 = vmul.f32 %v90_v25, %v83_v24 }
  0xa8   :  { %v57_v29 = vmul.f32 %v55_v26, %v53_v27 }
  0xa9   :  { %v92_v30 = vpop.eup %91 }
  0xaa   :  { %v66_v31 = vadd.f32 %v84_v28, %v57_v29  ;;  %v54_v33 = vmul.f32 %v92_v30, %v83_v24 }
  0xac   :  { %v87_v34 = vpack.c.bf16 %v66_v31, %v66_v31  ;;  %v58_v35 = vmul.f32 %v56_v32, %v54_v33 }
  0xae   :  { %77 = vst.msk [vmem:[%s134_s3] sm:$0xf] %vm76_vm1, %v87_v34  ;;  %v67_v36 = vadd.f32 %v84_v28, %v58_v35 }
  0xb0   :  { %v88_v37 = vpack.c.bf16 %v67_v36, %v67_v36 }
  0xb2   :  { %78 = vst.msk [vmem:[%s134_s3 + $0x4] sm:$0xf] %vm76_vm1, %v88_v37 }

// kernel: gist_minilm_forward.12
= control target key start
LH: loop header
LB: loop body
LE: loop exit
PB: predicated region body
PF: predicated region fallthrough
CT: control target
= control target key end

     0   :  { %v206_v0 = vmov 0.0   ;;  %vm207_vm0 = vmmov 0   ;;  %vm54_vm1 = vcmask 261120   ;;  %vm164_vm2 = vcmask 257024   ;;  %s275_s1 = inlined_call_operand.vmem [shape: bf16[32,32], index: 1, kind: input, shape index: {}]   ;;  %s276_s0 = inlined_call_operand.vmem [shape: bf16[16,32], index: 0, kind: input, shape index: {}]   ;;  %s277_s3 = inlined_call_operand.vmem [shape: bf16[16,32], index: 3, kind: input, shape index: {}]   ;;  %s278_s2 = inlined_call_operand.vmem [shape: f32[1,32], index: 2, kind: input, shape index: {}]   ;;  %s279_s4 = inlined_call_operand.vmem [shape: f32[1,32], index: 4, kind: input, shape index: {}]   ;;  %s280_s5 = inlined_call_operand.vmem [shape: f32[1,32], index: 5, kind: input, shape index: {}]   ;;  %s281_s6 = inlined_call_operand.vmem [shape: bf16[16,32], index: 6, kind: output, shape index: {}]  }
   0x1   :  { %189 = vmatprep.subr.bf16.mxu0 %v206_v0  ;;  %v199_v1 = vld [vmem:[%s275_s1] sm:$0xff]   ;;  %193 = vmatprep.mubr.msk.bf16.mxu0 %vm207_vm0, %v206_v0  ;;  %v200_v2 = vld [vmem:[%s275_s1 + $0x8] sm:$0xff]  }
   0x2   :  { %190 = vmatpush3.bf16.msra.mxu0 %v199_v1  ;;  %v201_v3 = vld [vmem:[%s276_s0] sm:$0xff]  }
   0x3   :  { %191 = vmatprep.subr.bf16.mxu0 %v206_v0  ;;  %v183_v4 = vld [vmem:[%s277_s3] sm:$0xff]  }
   0x4   :  { %v171_v5 = vld [vmem:[%s278_s2] ss:$0 sm:$0xff]  ;;  %v184_v6 = vunpack.c.l.bf16 %v183_v4  ;;  %v185_v10 = vunpack.c.h.bf16 %v183_v4 }
   0x5   :  { %v176_v38 = vld [vmem:[%s279_s4] ss:$0 sm:$0xff] }
   0x6   :  { %192 = vmatpush3.bf16.msra.mxu0 %v200_v2  ;;  %v177_v42 = vld [vmem:[%s280_s5] ss:$0 sm:$0xff] }
   0x9   :  { %194 = vmatmul.mubr.msk.bf16.vlgmr.msra.gmra.mrb[0].mxu0 %vm54_vm1, %v201_v3 }
  0xdc   :  { %v92_v7 = vpop.f32.mrb[0].mxu0 }
  0xdd   :  { %v93_v8 = vadd.f32 %v171_v5, %v92_v7  ;;  %v195_v9 = vpop.f32.mrb[1].mxu0 }
  0xde   :  { %v95_v11 = vpop.f32.mrb[2].mxu0 }
  0xdf   :  { %v103_v12 = vadd.f32 %v184_v6, %v93_v8  ;;  %v96_v13 = vadd.f32 %v171_v5, %v95_v11  ;;  %v196_v14 = vpop.f32.mrb[3].mxu0 }
  0xe1   :  { %v104_v15 = vadd.f32 %v185_v10, %v96_v13  ;;  %v105_v16 = vsel %vm54_vm1, %v103_v12, 0.0  ;;  %v114_v17 = vmul.f32 %v103_v12, %v103_v12 }
  0xe2   :  { %106 = vadd.xlane.f32.xlu0 %v105_v16 }
  0xe3   :  { %v116_v18 = vsel %vm54_vm1, %v114_v17, 0.0  ;;  %v115_v19 = vmul.f32 %v104_v15, %v104_v15  ;;  %v108_v20 = vsel %vm54_vm1, %v104_v15, 0.0 }
  0xe4   :  { %117 = vadd.xlane.f32.xlu1 %v116_v18 }
  0xe5   :  { %v119_v21 = vsel %vm54_vm1, %v115_v19, 0.0 }
  0xe6   :  { %109 = vadd.xlane.f32.xlu0 %v108_v20 }
  0xe8   :  { %120 = vadd.xlane.f32.xlu1 %v119_v21 }
 0x16f   :  { %v107_v22 = vpop.xlane.xlu0 %106 }
 0x170   :  { %v112_v23 = vmul.f32 0.03125, %v107_v22 }
 0x171   :  { %v118_v24 = vpop.xlane.xlu1 %117 }
 0x172   :  { %v124_v25 = vmul.f32 %v112_v23, %v112_v23  ;;  %v122_v26 = vmul.f32 0.03125, %v118_v24  ;;  %v143_v40 = vsub.f32 %v103_v12, %v112_v23 }
 0x173   :  { %v110_v27 = vpop.xlane.xlu0 %109 }
 0x174   :  { %v126_v28 = vsub.f32 %v122_v26, %v124_v25  ;;  %v113_v29 = vmul.f32 0.03125, %v110_v27 }
 0x175   :  { %v121_v30 = vpop.xlane.xlu1 %120 }
 0x176   :  { %v128_v31 = vmax.f32 %v126_v28, 0.0  ;;  %v125_v32 = vmul.f32 %v113_v29, %v113_v29  ;;  %v123_v33 = vmul.f32 0.03125, %v121_v30  ;;  %v144_v46 = vsub.f32 %v104_v15, %v113_v29 }
 0x178   :  { %v130_v34 = vadd.f32 1e-12, %v128_v31  ;;  %v127_v35 = vsub.f32 %v123_v33, %v125_v32 }
 0x17a   :  { %202 = vrsqrt.f32 %v130_v34  ;;  %v129_v36 = vmax.f32 %v127_v35, 0.0 }
 0x17c   :  { %v131_v37 = vadd.f32 1e-12, %v129_v36 }
 0x17e   :  { %204 = vrsqrt.f32 %v131_v37 }
 0x184   :  { %v203_v39 = vpop.eup %202 }
 0x185   :  { %v141_v41 = vmul.f32 %v203_v39, %v176_v38 }
 0x187   :  { %v145_v43 = vmul.f32 %v143_v40, %v141_v41 }
 0x188   :  { %v205_v44 = vpop.eup %204 }
 0x189   :  { %v154_v45 = vadd.f32 %v177_v42, %v145_v43  ;;  %v142_v47 = vmul.f32 %v205_v44, %v176_v38 }
 0x18b   :  { %v180_v48 = vpack.c.bf16 %v154_v45, %v154_v45  ;;  %v146_v49 = vmul.f32 %v144_v46, %v142_v47 }
 0x18d   :  { %165 = vst.msk [vmem:[%s281_s6] sm:$0xf] %vm164_vm2, %v180_v48  ;;  %v155_v50 = vadd.f32 %v177_v42, %v146_v49 }
 0x18f   :  { %v181_v51 = vpack.c.bf16 %v155_v50, %v155_v50 }
 0x191   :  { %166 = vst.msk [vmem:[%s281_s6 + $0x4] sm:$0xf] %vm164_vm2, %v181_v51 }

// kernel: gist_minilm_forward.11
= control target key start
LH: loop header
LB: loop body
LE: loop exit
PB: predicated region body
PF: predicated region fallthrough
CT: control target
= control target key end

     0   :  { %s1148_s15 = smov 0   ;;  %s1150_s16 = smov 0   ;;  %s1269_s0 = inlined_call_operand.vmem [shape: bf16[2,8,32], index: 0, kind: input, shape index: {}]   ;;  %s1270_s1 = inlined_call_operand.vmem [shape: bf16[1,32,96], index: 1, kind: input, shape index: {}]   ;;  %s1271_s2 = inlined_call_operand.vmem [shape: f32[1,1,96], index: 2, kind: input, shape index: {}]   ;;  %s1272_s3 = inlined_call_operand.vmem [shape: f32[2,1,8], index: 3, kind: input, shape index: {}]   ;;  %s1273_s4 = inlined_call_operand.vmem [shape: bf16[2,8,32], index: 4, kind: output, shape index: {}]  }
   0x1   :  { %s1152_s17 = smov 0  }
   0x2 LB: > { %s26_s18 = sadd.s32 1, %s1101_s16  ;;  %p926_p0 = scmp.ge.s32.totalorder %s1105_s17, 1  ;;  %s1105_s17 = sphi %s1152_s17, %s14_s17   ;;  %s1101_s16 = sphi %s1150_s16, %s1275_s16   ;;  %s1097_s15 = sphi %s1148_s15, %s1274_s15  }
   0x3   : > { %p28_p1 = scmp.ge.s32.totalorder %s26_s18, 2  ;;  %p201_p2 = scmp.lt.s32.totalorder %s1105_s17, 3 }
   0x5   : > { %s1277_s18 = smov (%p28_p1, %s26_s18), 0  ;;  %p202_p3 = pnand %p926_p0, %p201_p2 }
   0x6   : > { %v1065_v0 = vld [vmem:[%s1270_s1] sm:$0xff] (!%p202_p3)   ;;  %v1107_v1 = vmov (!%p202_p3), 0.0   ;;  %v1066_v2 = vld [vmem:[%s1270_s1 + $0x8] sm:$0xff] (!%p202_p3)   ;;  %vm1108_vm0 = vmmov (!%p202_p3), 0   ;;  %p239_p4 = scmp.lt.s32.totalorder (!%p202_p3), %s1097_s15, 1  ;;  %vm287_vm1 = vcmask (!%p202_p3), 261120  }
   0x7   : > { %205 = sbr.rel (%p202_p3) target bundleno = 1279 (0x4ff), region = 36  ;;  %969 = vmatprep.subr.bf16.mxu0 (!%p202_p3), %v1107_v1  ;;  %977 = vmatprep.subr.bf16.mxu1 (!%p202_p3), %v1107_v1  ;;  %v929_v4 = vld [vmem:[%s1271_s2] ss:$0 sm:$0xff] (!%p202_p3)  ;;  %s1109_s29 = smov (!%p202_p3), 96   ;;  %vm343_vm2 = vcmask (!%p202_p3), 64512   ;;  %vm407_vm3 = vcmask (!%p202_p3), 1043456  }
   0x8   : > { %970 = vmatpush3.bf16.msra.mxu0 (!%p202_p3), %v1065_v0  ;;  %973 = vmatprep.mubr.msk.bf16.mxu0 (!%p202_p3), %vm1108_vm0, %v1107_v1  ;;  %s1110_s30 = smov (!%p202_p3), 120   ;;  %s1111_s5 = smov (!%p202_p3), 88   ;;  %vm452_vm4 = vcmask (!%p202_p3), 60416   ;;  %vm572_vm5 = vcmask (!%p202_p3), 126016   ;;  %vm691_vm6 = vcmask (!%p202_p3), 191616   ;;  %vm810_vm7 = vcmask (!%p202_p3), 257216  }
   0x9   : > { %971 = vmatprep.subr.bf16.mxu0 (!%p202_p3), %v1107_v1  ;;  %979 = vmatprep.mubr.msk.bf16.mxu1 (!%p202_p3), %vm1108_vm0, %v1107_v1  ;;  %s1112_s6 = smov (!%p202_p3), 80   ;;  %s1113_s7 = smov (!%p202_p3), 112  }
   0xa   : > { %s1114_s8 = smov (!%p202_p3), 72   ;;  %s1115_s9 = smov (!%p202_p3), 104  }
   0xb   : > { %s1116_s13 = smov (!%p202_p3), 56   ;;  %s1117_s14 = smov (!%p202_p3), 64  }
   0xc   : > { %972 = vmatpush3.bf16.msra.mxu0 (!%p202_p3), %v1066_v2  ;;  %s1118_s19 = smov (!%p202_p3), 40   ;;  %s1119_s20 = smov (!%p202_p3), 48  }
   0xd   : > { %983 = vmatprep.subr.bf16.mxu0 (!%p202_p3), %v1107_v1  ;;  %s1120_s25 = smov (!%p202_p3), 8  }
   0xe   : > { %s1279_s15 = smov (!%p239_p4, %s1097_s15), 1 }
   0xf   : > { %s927_s23 = sshll.u32 %s1279_s15, 2  ;;  %s253_s12 = scalar_lea.vmem %s1272_s3, %s1279_s15 }
  0x10   : > { %s242_s26 = scalar_lea.vmem %s1269_s0, %s927_s23  ;;  %v933_v24 = vld [vmem:[%s253_s12] ss:$0 sm:$0xff]  ;;  %s1254_s24 = scalar_lea.vmem %s1273_s4, %s927_s23 }
  0x11   : > { %v262_v3 = vld [vmem:[%s242_s26] sm:$0xf]  ;;  %s1121_s15 = smov 16   ;;  %s1122_s23 = smov 24  }
  0x12   : > { %974 = vmatmul.mubr.msk.bf16.vlgmr.msra.gmra.mrb[0].mxu0 %vm287_vm1, %v262_v3 }
  0x13   : > { %985 = vmatprep.mubr.msk.bf16.mxu0 %vm1108_vm0, %v1107_v1 }
  0xe5   : > { %v325_v5 = vpop.f32.mrb[0].mxu0 }
  0xe6   : > { %v326_v6 = vadd.f32 %v929_v4, %v325_v5  ;;  %v975_v7 = vpop.f32.mrb[1].mxu0 }
  0xe7   : > { %v328_v8 = vpop.f32.mrb[2].mxu0 }
  0xe8   : > { %v331_v9 = vmul.f32 0.35355338, %v326_v6  ;;  %v1193_v10 = vpack.c.bf16 %v326_v6, %v326_v6  ;;  %v976_v11 = vpop.f32.mrb[3].mxu0 }
  0xea   : > { %v332_v12 = vpack.c.bf16 %v331_v9, %v331_v9  ;;  %341 = vrot.lane.b32.xlu0 %v1193_v10, %s1109_s29 }
  0xec   : > { %455 = vrot.lane.b32.xlu1 %v332_v12, %s1110_s30 }
  0xee   : > { %457 = vrot.lane.b32.xlu0 %v1193_v10, %s1111_s5 }
  0xf0   : > { %576 = vrot.lane.b32.xlu1 %v1193_v10, %s1112_s6 }
  0xf2   : > { %574 = vrot.lane.b32.xlu0 %v332_v12, %s1113_s7 }
  0xf4   : > { %695 = vrot.lane.b32.xlu1 %v1193_v10, %s1114_s8 }
  0xf6   : > { %693 = vrot.lane.b32.xlu0 %v332_v12, %s1115_s9 }
 0x15c   : > { %v342_v13 = vpop.permute.xlu0 %341 }
 0x15d   : > { %v348_v14 = vsel %vm343_vm2, %v342_v13, 0 }
 0x15e   : > { %978 = vmatpush3.bf16.xpose.msra.mxu1 %v348_v14  ;;  %v456_v16 = vpop.permute.xlu1 %455 }
 0x15f   : > { %989 = vmatprep.subr.bf16.mxu1 %v1107_v1 }
 0x160   : > { %v458_v15 = vpop.permute.xlu0 %457 }
 0x161   : > { %v463_v17 = vsel %vm343_vm2, %v458_v15, 0 }
 0x162   : > { %v577_v18 = vpop.permute.xlu1 %576 }
 0x163   : > { %v582_v19 = vsel %vm343_vm2, %v577_v18, 0 }
 0x164   : > { %v575_v21 = vpop.permute.xlu0 %574 }
 0x165   : > { %980 = vmatmul.mubr.msk.bf16.vlgmr.msra.gmra.mrb[0].mxu1 %vm343_vm2, %v332_v12 }
 0x166   : > { %990 = vmatpush3.bf16.xpose.msra.mxu1 %v463_v17  ;;  %991 = vmatprep.mubr.msk.bf16.mxu1 %vm1108_vm0, %v1107_v1  ;;  %v696_v20 = vpop.permute.xlu1 %695 }
 0x167   : > { %1001 = vmatprep.subr.bf16.mxu1 %v1107_v1  ;;  %v701_v22 = vsel %vm343_vm2, %v696_v20, 0 }
 0x168   : > { %v694_v23 = vpop.permute.xlu0 %693 }
 0x16d   : > { %992 = vmatmul.mubr.msk.bf16.vlgmr.msra.gmra.mrb[4].mxu1 %vm343_vm2, %v456_v16 }
 0x16e   : > { %1002 = vmatpush3.bf16.xpose.msra.mxu1 %v582_v19  ;;  %1003 = vmatprep.mubr.msk.bf16.mxu1 %vm1108_vm0, %v1107_v1 }
 0x16f   : > { %1013 = vmatprep.subr.bf16.mxu1 %v1107_v1 }
 0x175   : > { %1004 = vmatmul.mubr.msk.bf16.vlgmr.msra.gmra.mrb[8].mxu1 %vm343_vm2, %v575_v21 }
 0x176   : > { %1014 = vmatpush3.bf16.xpose.msra.mxu1 %v701_v22  ;;  %1015 = vmatprep.mubr.msk.bf16.mxu1 %vm1108_vm0, %v1107_v1 }
 0x17d   : > { %1016 = vmatmul.mubr.msk.bf16.vlgmr.msra.gmra.mrb[12].mxu1 %vm343_vm2, %v694_v23 }
 0x238   : > { %v384_v25 = vpop.f32.mrb[0].mxu1 }
 0x239   : > { %v385_v26 = vadd.f32 %v933_v24, %v384_v25  ;;  %v981_v27 = vpop.f32.mrb[1].mxu1 }
 0x23a   : > { %v387_v28 = vpop.f32.mrb[2].mxu1 }
 0x23b   : > { %v982_v29 = vpop.f32.mrb[3].mxu1  ;;  %v390_v30 = vsel %vm343_vm2, %v385_v26, -inf }
 0x23c   : > { %391 = vmax.xlane.f32.xlu1 %v390_v30 }
 0x240   : > { %v499_v31 = vpop.f32.mrb[4].mxu1 }
 0x241   : > { %v500_v32 = vadd.f32 %v933_v24, %v499_v31  ;;  %v993_v33 = vpop.f32.mrb[5].mxu1 }
 0x242   : > { %v502_v34 = vpop.f32.mrb[6].mxu1 }
 0x243   : > { %v994_v35 = vpop.f32.mrb[7].mxu1  ;;  %v505_v36 = vsel %vm343_vm2, %v500_v32, -inf }
 0x244   : > { %506 = vmax.xlane.f32.xlu0 %v505_v36 }
 0x248   : > { %v618_v37 = vpop.f32.mrb[8].mxu1 }
 0x249   : > { %v619_v38 = vadd.f32 %v933_v24, %v618_v37  ;;  %v1005_v39 = vpop.f32.mrb[9].mxu1 }
 0x24a   : > { %v621_v40 = vpop.f32.mrb[10].mxu1 }
 0x24b   : > { %v1006_v41 = vpop.f32.mrb[11].mxu1  ;;  %v624_v42 = vsel %vm343_vm2, %v619_v38, -inf }
 0x24c   : > { %625 = vmax.xlane.f32.xlu0 %v624_v42 }
 0x250   : > { %v737_v43 = vpop.f32.mrb[12].mxu1 }
 0x251   : > { %v738_v44 = vadd.f32 %v933_v24, %v737_v43  ;;  %v1017_v45 = vpop.f32.mrb[13].mxu1 }
 0x252   : > { %v740_v46 = vpop.f32.mrb[14].mxu1 }
 0x253   : > { %v1018_v47 = vpop.f32.mrb[15].mxu1  ;;  %v743_v48 = vsel %vm343_vm2, %v738_v44, -inf }
 0x254   : > { %744 = vmax.xlane.f32.xlu1 %v743_v48 }
 0x2c9   : > { %v392_v49 = vpop.xlane.xlu1 %391 }
 0x2ca   : > { %v393_v50 = vsub.f32 %v385_v26, %v392_v49 }
 0x2cc   : > { %v394_v51 = vmul.f32 1.442695, %v393_v50 }
 0x2ce   : > { %1067 = vpow2.f32 %v394_v51 }
 0x2d1   : > { %v507_v52 = vpop.xlane.xlu0 %506 }
 0x2d2   : > { %v508_v53 = vsub.f32 %v500_v32, %v507_v52 }
 0x2d4   : > { %v509_v54 = vmul.f32 1.442695, %v508_v53 }
 0x2d6   : > { %1069 = vpow2.f32 %v509_v54 }
 0x2d8   : > { %v1068_v55 = vpop.eup %1067 }
 0x2d9   : > { %v626_v56 = vpop.xlane.xlu0 %625  ;;  %v396_v57 = vsel %vm343_vm2, %v1068_v55, 0.0 }
 0x2da   : > { %v627_v58 = vsub.f32 %v619_v38, %v626_v56  ;;  %397 = vadd.xlane.f32.xlu0 %v396_v57 }
 0x2dc   : > { %v628_v59 = vmul.f32 1.442695, %v627_v58 }
 0x2de   : > { %1071 = vpow2.f32 %v628_v59 }
 0x2e0   : > { %v1070_v60 = vpop.eup %1069 }
 0x2e1   : > { %v511_v61 = vsel %vm343_vm2, %v1070_v60, 0.0  ;;  %v745_v0 = vpop.xlane.xlu1 %744 }
 0x2e2   : > { %512 = vadd.xlane.f32.xlu1 %v511_v61  ;;  %v746_v2 = vsub.f32 %v738_v44, %v745_v0 }
 0x2e4   : > { %v747_v3 = vmul.f32 1.442695, %v746_v2 }
 0x2e6   : > { %1073 = vpow2.f32 %v747_v3 }
 0x2e8   : > { %v1072_v62 = vpop.eup %1071 }
 0x2e9   : > { %v630_v63 = vsel %vm343_vm2, %v1072_v62, 0.0 }
 0x2ea   : > { %631 = vadd.xlane.f32.xlu0 %v630_v63 }
 0x2f0   : > { %v1074_v4 = vpop.eup %1073 }
 0x2f1   : > { %v749_v5 = vsel %vm343_vm2, %v1074_v4, 0.0 }
 0x2f3   : > { %517 = vrot.lane.b32.xlu1 %v1193_v10, %s1116_s13 }
 0x300   : > { %402 = vrot.lane.b32.xlu0 %v1193_v10, %s1117_s14 }
 0x304   : > { %755 = vrot.lane.b32.xlu0 %v1193_v10, %s1118_s19 }
 0x317   : > { %750 = vadd.xlane.f32.xlu1 %v749_v5 }
 0x328   : > { %636 = vrot.lane.b32.xlu1 %v1193_v10, %s1119_s20 }
 0x367   : > { %v398_v6 = vpop.xlane.xlu0 %397 }
 0x368   : > { %1075 = vrcp.f32 %v398_v6 }
 0x36f   : > { %v513_v7 = vpop.xlane.xlu1 %512 }
 0x370   : > { %1077 = vrcp.f32 %v513_v7 }
 0x372   : > { %v1076_v8 = vpop.eup %1075 }
 0x373   : > { %v400_v11 = vmul.f32 %v1076_v8, %v1068_v55  ;;  %v518_v14 = vpop.permute.xlu1 %517 }
 0x374   : > { %v523_v17 = vsel %vm407_vm3, %v518_v14, 0 }
 0x375   : > { %v401_v15 = vpack.c.bf16 %v400_v11, %v400_v11 }
 0x377   : > { %v632_v9 = vpop.xlane.xlu0 %631 }
 0x378   : > { %1079 = vrcp.f32 %v632_v9 }
 0x37a   : > { %v1078_v16 = vpop.eup %1077 }
 0x37b   : > { %v403_v12 = vpop.permute.xlu0 %402  ;;  %v515_v10 = vmul.f32 %v1078_v16, %v1070_v60 }
 0x37c   : > { %v409_v13 = vsel %vm407_vm3, %v403_v12, 0 }
 0x37d   : > { %984 = vmatpush3.bf16.msra.mxu0 %v409_v13  ;;  %v516_v18 = vpack.c.bf16 %v515_v10, %v515_v10 }
 0x37e   : > { %995 = vmatprep.subr.bf16.mxu0 %v1107_v1 }
 0x37f   : > { %v756_v24 = vpop.permute.xlu0 %755 }
 0x380   : > { %986 = vmatmul.mubr.msk.bf16.vlgmr.msra.gmra.mrb[4].mxu0 %vm343_vm2, %v401_v15  ;;  %v761_v26 = vsel %vm407_vm3, %v756_v24, 0 }
 0x381   : > { %996 = vmatpush3.bf16.msra.mxu0 %v523_v17  ;;  %997 = vmatprep.mubr.msk.bf16.mxu0 %vm1108_vm0, %v1107_v1 }
 0x382   : > { %1007 = vmatprep.subr.bf16.mxu0 %v1107_v1  ;;  %v1080_v19 = vpop.eup %1079 }
 0x383   : > { %v634_v21 = vmul.f32 %v1080_v19, %v1072_v62 }
 0x385   : > { %v635_v25 = vpack.c.bf16 %v634_v21, %v634_v21 }
 0x388   : > { %998 = vmatmul.mubr.msk.bf16.vlgmr.msra.gmra.mrb[8].mxu0 %vm343_vm2, %v516_v18 }
 0x389   : > { %1009 = vmatprep.mubr.msk.bf16.mxu0 %vm1108_vm0, %v1107_v1 }
 0x3a4   : > { %v751_v20 = vpop.xlane.xlu1 %750 }
 0x3a5   : > { %1081 = vrcp.f32 %v751_v20 }
 0x3a8   : > { %v637_v22 = vpop.permute.xlu1 %636 }
 0x3a9   : > { %v642_v23 = vsel %vm407_vm3, %v637_v22, 0 }
 0x3aa   : > { %1008 = vmatpush3.bf16.msra.mxu0 %v642_v23 }
 0x3ab   : > { %1019 = vmatprep.subr.bf16.mxu0 %v1107_v1 }
 0x3ad   : > { %1010 = vmatmul.mubr.msk.bf16.vlgmr.msra.gmra.mrb[12].mxu0 %vm343_vm2, %v635_v25 }
 0x3ae   : > { %1020 = vmatpush3.bf16.msra.mxu0 %v761_v26  ;;  %1021 = vmatprep.mubr.msk.bf16.mxu0 %vm1108_vm0, %v1107_v1 }
 0x3af   : > { %v1082_v27 = vpop.eup %1081 }
 0x3b0   : > { %v753_v28 = vmul.f32 %v1082_v27, %v1074_v4 }
 0x3b2   : > { %v754_v29 = vpack.c.bf16 %v753_v28, %v753_v28 }
 0x3b5   : > { %1022 = vmatmul.mubr.msk.bf16.vlgmr.msra.gmra.mrb[16].mxu0 %vm343_vm2, %v754_v29 }
 0x453   : > { %v445_v30 = vpop.f32.mrb[4].mxu0 }
 0x454   : > { %v451_v31 = vpack.c.bf16 %v445_v30, %v445_v30  ;;  %v987_v32 = vpop.f32.mrb[5].mxu0 }
 0x455   : > { %v448_v33 = vpop.f32.mrb[6].mxu0 }
 0x456   : > { %453 = vst.msk [vmem:[%s1254_s24] sm:$0xf] %vm452_vm4, %v451_v31  ;;  %v988_v34 = vpop.f32.mrb[7].mxu0 }
 0x45b   : > { %v559_v1 = vpop.f32.mrb[8].mxu0 }
 0x45c   : > { %v947_v35 = vpack.c.bf16 %v559_v1, %v559_v1  ;;  %v999_v36 = vpop.f32.mrb[9].mxu0 }
 0x45d   : > { %v562_v37 = vpop.f32.mrb[10].mxu0 }
 0x45e   : > { %569 = vrot.lane.b32.xlu1 %v947_v35, %s1120_s25  ;;  %v1000_v38 = vpop.f32.mrb[11].mxu0 }
 0x480   : > { %v678_v39 = vpop.f32.mrb[12].mxu0 }
 0x481   : > { %v948_v40 = vpack.c.bf16 %v678_v39, %v678_v39  ;;  %v1011_v41 = vpop.f32.mrb[13].mxu0 }
 0x482   : > { %v681_v42 = vpop.f32.mrb[14].mxu0 }
 0x483   : > { %688 = vrot.lane.b32.xlu0 %v948_v40, %s1121_s15  ;;  %v1012_v43 = vpop.f32.mrb[15].mxu0 }
 0x488   : > { %v797_v44 = vpop.f32.mrb[16].mxu0 }
 0x489   : > { %v949_v45 = vpack.c.bf16 %v797_v44, %v797_v44  ;;  %v1023_v46 = vpop.f32.mrb[17].mxu0 }
 0x48a   : > { %v800_v47 = vpop.f32.mrb[18].mxu0 }
 0x48b   : > { %807 = vrot.lane.b32.xlu1 %v949_v45, %s1122_s23  ;;  %v1024_v48 = vpop.f32.mrb[19].mxu0 }
 0x4d0   : > { %v570_v49 = vpop.permute.xlu1 %569 }
 0x4d1   : > { %573 = vst.msk [vmem:[%s1254_s24] sm:$0xf] %vm572_vm5, %v570_v49 }
 0x4f5   : > { %v689_v50 = vpop.permute.xlu0 %688 }
 0x4f6   : > { %692 = vst.msk [vmem:[%s1254_s24] sm:$0xf] %vm691_vm6, %v689_v50 }
 0x4fd   : > { %v808_v51 = vpop.permute.xlu1 %807 }
 0x4fe   : > { %811 = vst.msk [vmem:[%s1254_s24] sm:$0xf] %vm810_vm7, %v808_v51 }
 0x4ff PF: > { %s14_s17 = sadd.s32 1, %s1105_s17   ;;  %s1274_s15 = smov %s1101_s16 }
 0x500   : > { %p11_p5 = scmp.ge.s32.totalorder %s14_s17, 4   ;;  %s1275_s16 = smov %s1277_s18 }
 0x502   :  { %13 = sbr.rel (!%p11_p5) target bundleno = 2 (0x2), region = 75 }

// kernel: gist_minilm_forward.19
= control target key start
LH: loop header
LB: loop body
LE: loop exit
PB: predicated region body
PF: predicated region fallthrough
CT: control target
= control target key end

     0   :  { %vm48_vm0 = vcmask 58368   ;;  %v17_v1 = vlaneseq  ;;  %s183_s0 = inlined_call_operand.vmem [shape: bf16[2,8,32], index: 0, kind: input, shape index: {}]   ;;  %s184_s1 = inlined_call_operand.vmem [shape: f32[2,8], index: 1, kind: input, shape index: {}]   ;;  %s185_s2 = inlined_call_operand.hbm [shape: f32[2,32], index: 2, kind: output, shape index: {}]  }
   0x1   :  { %v16_v0 = vld [vmem:[%s184_s1] sm:$0x3] }
   0x2   :  { %v49_v2 = vsel %vm48_vm0, %v16_v0, 0.0 }
   0x3   :  { %7 = vsyncpa [#allocation3], 0  ;;  %50 = vadd.xlane.f32.xlu0 %v49_v2  ;;  %v18_v3 = vshrl.u32 %v17_v1, 7  ;;  %v109_v8 = vld [vmem:[%s183_s0] sm:$0xff]   ;;  %vm33_vm1 = vcmask 261120   ;;  %vm65_vm2 = vcmask 1041409  }
   0x4   :  { %v110_v9 = vunpack.c.l.bf16 %v109_v8  ;;  %v111_v17 = vunpack.c.h.bf16 %v109_v8  ;;  %vm68_vm3 = vcmask 254976   ;;  %s145_s0 = smov [#allocation2]  }
   0x5   :  { %v19_v4 = vsub.s32 0, %v18_v3  ;;  %v26_v6 = vsub.s32 1, %v18_v3  ;;  %s100_s1 = sshll.u32 %s145_s0, 4  ;;  %s101_s1 = int_to_ptr.vmem [resolvable:$true] %s100_s1 }
   0x6   :  { %s121_s13 = scalar_lea.vmem %s101_s1, 32  ;;  %p126_p1 = scmp.lt.s32.totalorder %s101_s1, %s101_s1 }
   0x7   :  { %v20_v5 = vrot.slane %v16_v0, %v19_v4  ;;  %v27_v7 = vrot.slane %v16_v0, %v26_v6  ;;  %p122_p0 = scmp.ne.s32.totalorder %s101_s1, %s121_s13  ;;  %p127_p2 = scmp.lt.s32.totalorder %s121_s13, %s121_s13 }
   0x9   :  { %22 = vbcast.lane.b32.xlu1 %v20_v5, 256  ;;  %p128_p3 = por %p127_p2, %p126_p1 }
   0xb   :  { %p129_p4 = pnand %p128_p3, %p122_p0 }
  0x19   :  { %29 = vbcast.lane.b32.xlu0 %v27_v7, 256 }
  0x7b   :  { %v23_v10 = vpop.permute.xlu1 %22 }
  0x7c   :  { %v31_v11 = vmul.f32 %v110_v9, %v23_v10 }
  0x7e   :  { %v34_v12 = vsel %vm33_vm1, %v31_v11, 0.0 }
  0x7f   :  { %v35_v13 = vrot.slane %v34_v12, 4 }
  0x81   :  { %v36_v14 = vadd.f32 %v35_v13, %v34_v12 }
  0x83   :  { %v37_v18 = vrot.slane %v36_v14, 2 }
  0x85   :  { %v38_v22 = vadd.f32 %v37_v18, %v36_v14 }
  0x87   :  { %v39_v25 = vrot.slane %v38_v22, 1 }
  0x89   :  { %v40_v29 = vadd.f32 %v39_v25, %v38_v22 }
  0x90   :  { %v51_v15 = vpop.xlane.xlu0 %50 }
  0x91   :  { %v52_v16 = vmax.f32 %v51_v15, 1e-09 }
  0x93   :  { %113 = vrcp.f32 %v52_v16 }
  0x94   :  { %v30_v19 = vpop.permute.xlu0 %29 }
  0x95   :  { %v32_v20 = vmul.f32 %v111_v17, %v30_v19 }
  0x97   :  { %v41_v21 = vsel %vm33_vm1, %v32_v20, 0.0 }
  0x98   :  { %v42_v23 = vrot.slane %v41_v21, 4 }
  0x9a   :  { %v43_v24 = vadd.f32 %v42_v23, %v41_v21 }
  0x9c   :  { %v44_v26 = vrot.slane %v43_v24, 2 }
  0x9d   :  { %v114_v28 = vpop.eup %113 }
  0x9e   :  { %v45_v27 = vadd.f32 %v44_v26, %v43_v24  ;;  %v55_v32 = vrot.slane %v114_v28, 1  ;;  %v58_v33 = vmul.f32 %v114_v28, %v40_v29 }
  0xa0   :  { %v46_v30 = vrot.slane %v45_v27, 1  ;;  %v60_v36 = vmul.f32 %v58_v33, %v58_v33 }
  0xa2   :  { %v47_v31 = vadd.f32 %v46_v30, %v45_v27 }
  0xa4   :  { %v59_v34 = vmul.f32 %v55_v32, %v47_v31 }
  0xa6   :  { %v61_v35 = vmul.f32 %v59_v34, %v59_v34 }
  0xa8   :  { %v64_v37 = vrot.slane %v61_v35, 7 }
  0xaa   :  { %v66_v38 = vsel %vm65_vm2, %v64_v37, %v60_v36 }
  0xab   :  { %v69_v39 = vsel %vm68_vm3, %v66_v38, 0.0 }
  0xac   :  { %70 = vadd.xlane.f32.xlu1 %v69_v39 }
 0x139   :  { %v71_v40 = vpop.xlane.xlu1 %70 }
 0x13a   :  { %115 = vrsqrt.f32 %v71_v40  ;;  %vm74_vm4 = vcmp.eq.f32.partialorder %v71_v40, inf  ;;  %v77_v43 = vand.u32 2147483648, %v71_v40  ;;  %vm76_vm5 = vcmp.eq.f32.partialorder %v71_v40, 0.0 }
 0x144   :  { %v116_v41 = vpop.eup %115 }
 0x145   :  { %v73_v42 = vmul.f32 %v116_v41, %v71_v40 }
 0x147   :  { %v75_v44 = vsel %vm74_vm4, %v71_v40, %v73_v42 }
 0x148   :  { %v78_v45 = vsel %vm76_vm5, %v77_v43, %v75_v44 }
 0x149   :  { %v79_v46 = vmax.f32 %v78_v45, 1e-12 }
 0x14b   :  { %v81_v47 = vrot.slane %v79_v46, 1  ;;  %117 = vrcp.f32 %v79_v46 }
 0x14d   :  { %119 = vrcp.f32 %v81_v47 }
 0x155   :  { %v118_v48 = vpop.eup %117 }
 0x156   :  { %v85_v51 = vmul.f32 %v118_v48, %v58_v33 }
 0x157   :  { %v120_v49 = vpop.eup %119 }
 0x158   :  { %v87_v50 = vmul.f32 %v120_v49, %v59_v34 }
 0x15a   :  { %v90_v52 = vrot.slane %v87_v50, 7 }
 0x15c   :  { %v91_v53 = vsel %vm65_vm2, %v90_v52, %v85_v51 }
 0x15d   :  { %93 = vst.msk [vmem:[#allocation2] sm:$0x3] %vm68_vm3, %v91_v53 }
 0x15e   :  { %132 = shalt.err (!%p129_p4)
}
 0x15f   :  { %s133_s16 = scalar_lea.hbm %s185_s2, 32 }
 0x160   :  { %p134_p5 = scmp.ne.s32.totalorder %s185_s2, %s133_s16  ;;  %p137_p6 = scmp.lt.u32.totalorder %s133_s16, %s185_s2 }
 0x162   :  { %p139_p7 = pnand %p137_p6, %p134_p5 }
 0x164   :  { %142 = shalt.err (!%p139_p7)
}
 0x165   :  { %103 = dma.vmem_to_hbm [thread:$0]  %s101_s1, 32, %s185_s2, [#allocation3]  }
 0x166   :  { %143 = dma.done.wait [#allocation3], 32  }
 0x167   :  { %144 = vsyncadd [#allocation3], 4294967264 }
 0x168   :  { %107 = vsyncpa [#allocation3], 1 }

// kernel: gist_minilm_forward.14
= control target key start
LH: loop header
LB: loop body
LE: loop exit
PB: predicated region body
PF: predicated region fallthrough
CT: control target
= control target key end

     0   :  { %v233_v0 = vmov 0.0   ;;  %vm234_vm0 = vmmov 0   ;;  %vm70_vm1 = vcmask 523264   ;;  %vm121_vm2 = vcmask 261120   ;;  %s303_s1 = inlined_call_operand.vmem [shape: bf16[64,32], index: 1, kind: input, shape index: {}]   ;;  %s304_s0 = inlined_call_operand.vmem [shape: bf16[16,64], index: 0, kind: input, shape index: {}]   ;;  %s305_s3 = inlined_call_operand.vmem [shape: bf16[16,32], index: 3, kind: input, shape index: {}]   ;;  %s306_s2 = inlined_call_operand.vmem [shape: f32[1,32], index: 2, kind: input, shape index: {}]   ;;  %s307_s4 = inlined_call_operand.vmem [shape: f32[1,32], index: 4, kind: input, shape index: {}]   ;;  %s308_s5 = inlined_call_operand.vmem [shape: f32[1,32], index: 5, kind: input, shape index: {}]   ;;  %s309_s6 = inlined_call_operand.vmem [shape: bf16[16,32], index: 6, kind: output, shape index: {}]  }
   0x1   :  { %210 = vmatprep.subr.bf16.mxu0 %v233_v0  ;;  %v224_v1 = vld [vmem:[%s303_s1] sm:$0xff]   ;;  %218 = vmatprep.mubr.msk.bf16.mxu0 %vm234_vm0, %v233_v0  ;;  %v225_v2 = vld [vmem:[%s303_s1 + $0x8] sm:$0xff]   ;;  %v226_v3 = vld [vmem:[%s303_s1 + $0x10] sm:$0xff]   ;;  %vm181_vm3 = vcmask 257024  }
   0x2   :  { %211 = vmatpush3.bf16.msra.mxu0 %v224_v1  ;;  %v227_v4 = vld [vmem:[%s303_s1 + $0x18] sm:$0xff]   ;;  %v228_v5 = vld [vmem:[%s304_s0] sm:$0xff]  }
   0x3   :  { %212 = vmatprep.subr.bf16.mxu0 %v233_v0  ;;  %v202_v6 = vld [vmem:[%s305_s3] sm:$0xff]  }
   0x4   :  { %v188_v7 = vld [vmem:[%s306_s2] ss:$0 sm:$0xff]  ;;  %v203_v8 = vunpack.c.l.bf16 %v202_v6  ;;  %v204_v12 = vunpack.c.h.bf16 %v202_v6 }
   0x5   :  { %v195_v40 = vld [vmem:[%s307_s4] ss:$0 sm:$0xff] }
   0x6   :  { %213 = vmatpush3.bf16.msra.mxu0 %v225_v2  ;;  %v196_v44 = vld [vmem:[%s308_s5] ss:$0 sm:$0xff] }
   0x7   :  { %214 = vmatprep.subr.bf16.mxu0 %v233_v0 }
   0xa   :  { %215 = vmatpush3.bf16.msra.mxu0 %v226_v3 }
   0xb   :  { %216 = vmatprep.subr.bf16.mxu0 %v233_v0 }
   0xe   :  { %217 = vmatpush3.bf16.msra.mxu0 %v227_v4 }
  0x11   :  { %219 = vmatmul.mubr.msk.bf16.vlgmr.msra.gmra.mrb[0].mxu0 %vm70_vm1, %v228_v5 }
  0xe4   :  { %v108_v9 = vpop.f32.mrb[0].mxu0 }
  0xe5   :  { %v109_v10 = vadd.f32 %v188_v7, %v108_v9  ;;  %v220_v11 = vpop.f32.mrb[1].mxu0 }
  0xe6   :  { %v111_v13 = vpop.f32.mrb[2].mxu0 }
  0xe7   :  { %v119_v14 = vadd.f32 %v203_v8, %v109_v10  ;;  %v112_v15 = vadd.f32 %v188_v7, %v111_v13  ;;  %v221_v16 = vpop.f32.mrb[3].mxu0 }
  0xe9   :  { %v120_v17 = vadd.f32 %v204_v12, %v112_v15  ;;  %v122_v18 = vsel %vm121_vm2, %v119_v14, 0.0  ;;  %v131_v19 = vmul.f32 %v119_v14, %v119_v14 }
  0xea   :  { %123 = vadd.xlane.f32.xlu0 %v122_v18 }
  0xeb   :  { %v133_v20 = vsel %vm121_vm2, %v131_v19, 0.0  ;;  %v132_v21 = vmul.f32 %v120_v17, %v120_v17  ;;  %v125_v22 = vsel %vm121_vm2, %v120_v17, 0.0 }
  0xec   :  { %134 = vadd.xlane.f32.xlu1 %v133_v20 }
  0xed   :  { %v136_v23 = vsel %vm121_vm2, %v132_v21, 0.0 }
  0xee   :  { %126 = vadd.xlane.f32.xlu0 %v125_v22 }
  0xf0   :  { %137 = vadd.xlane.f32.xlu1 %v136_v23 }
 0x177   :  { %v124_v24 = vpop.xlane.xlu0 %123 }
 0x178   :  { %v129_v25 = vmul.f32 0.03125, %v124_v24 }
 0x179   :  { %v135_v26 = vpop.xlane.xlu1 %134 }
 0x17a   :  { %v141_v27 = vmul.f32 %v129_v25, %v129_v25  ;;  %v139_v28 = vmul.f32 0.03125, %v135_v26  ;;  %v160_v42 = vsub.f32 %v119_v14, %v129_v25 }
 0x17b   :  { %v127_v29 = vpop.xlane.xlu0 %126 }
 0x17c   :  { %v143_v30 = vsub.f32 %v139_v28, %v141_v27  ;;  %v130_v31 = vmul.f32 0.03125, %v127_v29 }
 0x17d   :  { %v138_v32 = vpop.xlane.xlu1 %137 }
 0x17e   :  { %v145_v33 = vmax.f32 %v143_v30, 0.0  ;;  %v142_v34 = vmul.f32 %v130_v31, %v130_v31  ;;  %v140_v35 = vmul.f32 0.03125, %v138_v32  ;;  %v161_v48 = vsub.f32 %v120_v17, %v130_v31 }
 0x180   :  { %v147_v36 = vadd.f32 1e-12, %v145_v33  ;;  %v144_v37 = vsub.f32 %v140_v35, %v142_v34 }
 0x182   :  { %229 = vrsqrt.f32 %v147_v36  ;;  %v146_v38 = vmax.f32 %v144_v37, 0.0 }
 0x184   :  { %v148_v39 = vadd.f32 1e-12, %v146_v38 }
 0x186   :  { %231 = vrsqrt.f32 %v148_v39 }
 0x18c   :  { %v230_v41 = vpop.eup %229 }
 0x18d   :  { %v158_v43 = vmul.f32 %v230_v41, %v195_v40 }
 0x18f   :  { %v162_v45 = vmul.f32 %v160_v42, %v158_v43 }
 0x190   :  { %v232_v46 = vpop.eup %231 }
 0x191   :  { %v171_v47 = vadd.f32 %v196_v44, %v162_v45  ;;  %v159_v49 = vmul.f32 %v232_v46, %v195_v40 }
 0x193   :  { %v199_v50 = vpack.c.bf16 %v171_v47, %v171_v47  ;;  %v163_v51 = vmul.f32 %v161_v48, %v159_v49 }
 0x195   :  { %182 = vst.msk [vmem:[%s309_s6] sm:$0xf] %vm181_vm3, %v199_v50  ;;  %v172_v52 = vadd.f32 %v196_v44, %v163_v51 }
 0x197   :  { %v200_v53 = vpack.c.bf16 %v172_v52, %v172_v52 }
 0x199   :  { %183 = vst.msk [vmem:[%s309_s6 + $0x4] sm:$0xf] %vm181_vm3, %v200_v53 }

</bundles_post_ra>
